<compile_context>
chip_gen: v7x
topology: tpu7x:2x2x1
jax: 0.10.0
libtpu: 0.0.40
codegen_flags: <defaults>
</compile_context>

<pallas_src>
import functools

import jax
import jax.numpy as jnp
from jax.experimental import pallas as pl
from jax.experimental.pallas import tpu as pltpu

EPS = 0.0                               # GIN epsilon (PyG default init)
LANE = 128                              # lane width / MXU alignment
MAX_EDGE_TILE = 2048                    # absolute cap on the edge-axis tile
EDGE_STREAM_BUDGET = 24 * 1024 * 1024   # v7x-safe budget for the double-
                                        # buffered edge-varying bf16 streams


def _round_up(n, m):
    return ((n + m - 1) // m) * m


def _pad_to(a, shape):
    return jnp.pad(a, [(0, s - d) for d, s in zip(a.shape, shape)])


def _choose_edge_tile(ep, np_, fp):
    """Largest lane-aligned edge tile whose double-buffered bf16 edge streams
    (edge_attr + gather + scatter) stay inside EDGE_STREAM_BUDGET."""
    per_row = 2 * 2 * (fp + 2 * np_)            # 2 buffers x bf16 bytes / edge row
    cap = max(LANE, (EDGE_STREAM_BUDGET // per_row) // LANE * LANE)
    cap = min(cap, MAX_EDGE_TILE)
    return min(ep, cap)


def _vmem_limit_bytes(np_, fp, hp, op, b, et):
    blocked = (
        np_ * fp * 4                 # x (f32)
        + et * fp * 2                # edge_attr (bf16)
        + et * np_ * 2               # gather (bf16)
        + np_ * et * 2               # scatter (bf16)
        + b * np_ * 4                # pool (f32)
        + fp * hp * 2 + hp * 4       # W1 (bf16) + b1 (f32)
        + hp * hp * 2 + hp * 4       # W2 + b2
        + 2 * hp * hp * 2 + hp * 4   # Wc1 + bc1
        + hp * op * 2 + op * 4       # Wc2 + bc2
        + b * op * 4                 # out
    )
    scratch = np_ * fp * 4 + 2 * b * hp * 4 + np_ * fp * 2
    # double-buffering on every pipelined block + headroom for compiler temps
    return min(128 * 1024 * 1024, int(2 * blocked + scratch + (4 << 20)))


# ----------------------------------------------------------------------------
# Fused kernel: GINE message passing + node MLP + mean pool + classifier
# ----------------------------------------------------------------------------
def fused_kernel(x_ref, ea_ref, gat_ref, sct_ref, pool_ref,
                 w1_ref, b1_ref, w2_ref, b2_ref,
                 wc1_ref, bc1_ref, wc2_ref, bc2_ref,
                 out_ref, agg_ref, emb_ref, xbf_ref, *, eps, sigmoid):
    g = pl.program_id(0)              # which input graph-batch (g1 / g2)
    e = pl.program_id(1)              # edge tile (reduction axis, last)
    last_g = pl.num_programs(0) - 1
    last_e = pl.num_programs(1) - 1

    @pl.when(e == 0)
    def _():
        agg_ref[...] = jnp.zeros_like(agg_ref)
        # hoisted cast: one (NP, FP) VPU cast per graph, not per edge tile
        xbf_ref[...] = x_ref[0].astype(jnp.bfloat16)

    # --- message passing over this edge tile (bf16 MXU, f32 accumulate) ---
    src = jnp.dot(gat_ref[0], xbf_ref[...],
                  preferred_element_type=jnp.float32)              # (ET, FP)
    msg = jnp.maximum(src + ea_ref[0], 0.0)                        # f32 (ET, FP)
    agg_ref[...] += jnp.dot(sct_ref[0], msg.astype(jnp.bfloat16),
                            preferred_element_type=jnp.float32)    # (NP, FP)

    # --- GIN combine + node MLP + global mean pool (last edge tile) ---
    @pl.when(e == last_e)
    def _():
        h = (1.0 + eps) * x_ref[0] + agg_ref[...]                  # f32 (NP, FP)
        h1 = jnp.maximum(
            jnp.dot(h.astype(jnp.bfloat16), w1_ref[...],
                    preferred_element_type=jnp.float32) + b1_ref[...], 0.0)
        h2 = jnp.dot(h1.astype(jnp.bfloat16), w2_ref[...],
                     preferred_element_type=jnp.float32) + b2_ref[...]
        # mean-pool weights stay f32 for exactness (tiny matmul)
        pooled = jnp.dot(pool_ref[0], h2,
                         preferred_element_type=jnp.float32)       # (B, HP)
        emb_ref[g] = pooled

    # --- classifier epilogue on the very last grid step ---
    @pl.when(jnp.logical_and(g == last_g, e == last_e))
    def _():
        # concat([emb1, emb2]) @ Wc1  ==  emb1 @ Wc1[0] + emb2 @ Wc1[1]
        hc = (jnp.dot(emb_ref[0].astype(jnp.bfloat16), wc1_ref[0],
                      preferred_element_type=jnp.float32)
              + jnp.dot(emb_ref[1].astype(jnp.bfloat16), wc1_ref[1],
                        preferred_element_type=jnp.float32)
              + bc1_ref[...])
        hc = jnp.maximum(hc, 0.0)                                  # (B, HP)
        o = jnp.dot(hc.astype(jnp.bfloat16), wc2_ref[...],
                    preferred_element_type=jnp.float32) + bc2_ref[...]
        if sigmoid:
            o = jax.nn.sigmoid(o)
        out_ref[...] = o                                           # (B, OP)


# ----------------------------------------------------------------------------
# Wrapper
# ----------------------------------------------------------------------------
def graph_isomorphism_forward(params, g1, g2, *, sigmoid=False):
    """Mirrors GraphIsomorphismModel.forward (same gnn applied to both graphs)."""
    w1, b1, w2, b2 = params["gnn"]
    wc1, bc1, wc2, bc2 = params["classifier"]

    # stack the two graph batches along a leading "graph" grid axis
    x = jnp.stack([g1["x"], g2["x"]])                   # (2, NP, FP) f32
    ea = jnp.stack([g1["edge_attr"], g2["edge_attr"]])  # (2, EP, FP) bf16
    gat = jnp.stack([g1["gather"], g2["gather"]])       # (2, EP, NP) bf16
    sct = jnp.stack([g1["scatter"], g2["scatter"]])     # (2, NP, EP) bf16
    pool = jnp.stack([g1["pool"], g2["pool"]])          # (2, B,  NP) f32

    _, NP, FP = x.shape
    EP = ea.shape[1]
    HP = w2.shape[1]
    OP = wc2.shape[1]
    B = pool.shape[1]
    ET = _choose_edge_tile(EP, NP, FP)
    n_edge_tiles = EP // ET

    in_specs = [
        pl.BlockSpec((1, NP, FP), lambda g, e: (g, 0, 0)),   # x
        pl.BlockSpec((1, ET, FP), lambda g, e: (g, e, 0)),   # edge_attr
        pl.BlockSpec((1, ET, NP), lambda g, e: (g, e, 0)),   # gather
        pl.BlockSpec((1, NP, ET), lambda g, e: (g, 0, e)),   # scatter
        pl.BlockSpec((1, B, NP), lambda g, e: (g, 0, 0)),    # pool
        pl.BlockSpec((FP, HP), lambda g, e: (0, 0)),         # W1
        pl.BlockSpec((1, HP), lambda g, e: (0, 0)),          # b1
        pl.BlockSpec((HP, HP), lambda g, e: (0, 0)),         # W2
        pl.BlockSpec((1, HP), lambda g, e: (0, 0)),          # b2
        pl.BlockSpec((2, HP, HP), lambda g, e: (0, 0, 0)),   # Wc1 (split halves)
        pl.BlockSpec((1, HP), lambda g, e: (0, 0)),          # bc1
        pl.BlockSpec((HP, OP), lambda g, e: (0, 0)),         # Wc2
        pl.BlockSpec((1, OP), lambda g, e: (0, 0)),          # bc2
    ]
    out_spec = pl.BlockSpec((B, OP), lambda g, e: (0, 0))

    operands = (x, ea, gat, sct, pool, w1, b1, w2, b2, wc1, bc1, wc2, bc2)

    flops_per_graph = (
        2 * EP * NP * FP          # gather matmul
        + 2 * NP * EP * FP        # scatter-add matmul
        + 2 * NP * FP * HP        # node MLP layer 1
        + 2 * NP * HP * HP        # node MLP layer 2
        + 2 * B * NP * HP         # mean pool
    )
    clf_flops = 2 * (2 * B * HP * HP) + 2 * B * HP * OP
    cost = pl.CostEstimate(
        flops=int(2 * flops_per_graph + clf_flops),
        transcendentals=int(B * OP) if sigmoid else 0,
        bytes_accessed=int(sum(a.size * a.dtype.itemsize for a in operands)
                           + B * OP * 4),
    )

    out = pl.pallas_call(
        functools.partial(fused_kernel, eps=EPS, sigmoid=sigmoid),
        out_shape=jax.ShapeDtypeStruct((B, OP), jnp.float32),
        grid_spec=pltpu.PrefetchScalarGridSpec(
            num_scalar_prefetch=0,
            grid=(2, n_edge_tiles),
            in_specs=in_specs,
            out_specs=out_spec,
            scratch_shapes=[
                pltpu.VMEM((NP, FP), jnp.float32),    # agg accumulator
                pltpu.VMEM((2, B, HP), jnp.float32),  # per-graph embeddings
                pltpu.VMEM((NP, FP), jnp.bfloat16),   # hoisted bf16 copy of x
            ],
        ),
        compiler_params=pltpu.CompilerParams(
            # graph axis must stay sequential: classifier epilogue reads both
            # embeddings from the shared VMEM scratch; edge axis is a reduction.
            dimension_semantics=("arbitrary", "arbitrary"),
            vmem_limit_bytes=_vmem_limit_bytes(NP, FP, HP, OP, B, ET),
        ),
        cost_estimate=cost,
    )(*operands)

    return out[:, :params["out_dim"]]


# ----------------------------------------------------------------------------
# Graph / parameter construction (glue, plain JAX)
# ----------------------------------------------------------------------------
def build_graph(key, num_nodes, num_edges, feat_dim, num_graphs):
    k_x, k_e, k_a = jax.random.split(key, 3)
    x = jax.random.normal(k_x, (num_nodes, feat_dim), jnp.float32)
    edge_index = jax.random.randint(k_e, (2, num_edges), 0, num_nodes)
    edge_attr = jax.random.normal(k_a, (num_edges, feat_dim), jnp.float32)
    nodes_per_graph = num_nodes // num_graphs          # equal-sized graphs
    batch = jnp.repeat(jnp.arange(num_graphs), nodes_per_graph)

    NP = _round_up(max(num_nodes, 8), LANE)
    FP = _round_up(feat_dim, LANE)
    ep0 = _round_up(max(num_edges, 8), LANE)
    ET = _choose_edge_tile(ep0, NP, FP)
    EP = _round_up(ep0, ET)

    # one-hot gather/scatter (exact 0/1 -> bf16), mean-pool weights stay f32
    gather = jax.nn.one_hot(edge_index[0], num_nodes, dtype=jnp.float32)     # (E, N)
    scatter = jax.nn.one_hot(edge_index[1], num_nodes, dtype=jnp.float32).T  # (N, E)
    one_hot_batch = jax.nn.one_hot(batch, num_graphs, dtype=jnp.float32)     # (N, B)
    counts = jnp.maximum(jnp.sum(one_hot_batch, axis=0, keepdims=True), 1.0)
    pool = (one_hot_batch / counts).T                                        # (B, N)

    return {
        "x": _pad_to(x, (NP, FP)),
        "edge_attr": _pad_to(edge_attr, (EP, FP)).astype(jnp.bfloat16),
        "gather": _pad_to(gather, (EP, NP)).astype(jnp.bfloat16),
        "scatter": _pad_to(scatter, (NP, EP)).astype(jnp.bfloat16),
        "pool": _pad_to(pool, (num_graphs, NP)),
        "edge_index": edge_index,
        "batch": batch,
    }


def init_params(key, feat_dim, hidden, out_dim=1):
    ks = jax.random.split(key, 4)
    scale = 0.1
    FP = _round_up(feat_dim, LANE)
    HP = _round_up(hidden, LANE)
    OP = _round_up(out_dim, LANE)

    w1 = scale * jax.random.normal(ks[0], (feat_dim, hidden), jnp.float32)
    w2 = scale * jax.random.normal(ks[1], (hidden, hidden), jnp.float32)
    wc1 = scale * jax.random.normal(ks[2], (2 * hidden, hidden), jnp.float32)
    wc2 = scale * jax.random.normal(ks[3], (hidden, out_dim), jnp.float32)

    # matmul weights in bf16 (MXU rate, half the HBM/VMEM bytes); biases f32
    gnn = (
        _pad_to(w1, (FP, HP)).astype(jnp.bfloat16),
        jnp.zeros((1, HP), jnp.float32),
        _pad_to(w2, (HP, HP)).astype(jnp.bfloat16),
        jnp.zeros((1, HP), jnp.float32),
    )
    classifier = (
        jnp.stack([_pad_to(wc1[:hidden], (HP, HP)),
                   _pad_to(wc1[hidden:], (HP, HP))]).astype(jnp.bfloat16),  # (2, HP, HP)
        jnp.zeros((1, HP), jnp.float32),
        _pad_to(wc2, (HP, OP)).astype(jnp.bfloat16),
        jnp.zeros((1, OP), jnp.float32),
    )
    return {"gnn": gnn, "classifier": classifier, "out_dim": out_dim}


if __name__ == "__main__":
    num_nodes, num_edges, feat_dim, hidden, num_graphs = 16, 32, 8, 32, 2

    root = jax.random.PRNGKey(0)
    k_g1, k_g2, k_p = jax.random.split(root, 3)

    g1 = build_graph(k_g1, num_nodes, num_edges, feat_dim, num_graphs)
    g2 = build_graph(k_g2, num_nodes, num_edges, feat_dim, num_graphs)
    params = init_params(k_p, feat_dim, hidden)

    out = graph_isomorphism_forward(params, g1, g2, sigmoid=False)
    out_sig = graph_isomorphism_forward(params, g1, g2, sigmoid=True)
    jax.block_until_ready(out)
    jax.block_until_ready(out_sig)

    assert out.shape == (num_graphs, 1)
    assert out_sig.shape == (num_graphs, 1)
    print("KERNEL_OK")
</pallas_src>

<mosaic_0001>
module attributes {stable_mosaic.version = 11 : i64} {
  func.func @fused_kernel(%arg0: i32, %arg1: i32, %arg2: memref<1x128x128xf32, #tpu.memory_space<vmem>>, %arg3: memref<1x128x128xbf16, #tpu.memory_space<vmem>>, %arg4: memref<1x128x128xbf16, #tpu.memory_space<vmem>>, %arg5: memref<1x128x128xbf16, #tpu.memory_space<vmem>>, %arg6: memref<1x2x128xf32, #tpu.memory_space<vmem>>, %arg7: memref<128x128xbf16, #tpu.memory_space<vmem>>, %arg8: memref<1x128xf32, #tpu.memory_space<vmem>>, %arg9: memref<128x128xbf16, #tpu.memory_space<vmem>>, %arg10: memref<1x128xf32, #tpu.memory_space<vmem>>, %arg11: memref<2x128x128xbf16, #tpu.memory_space<vmem>>, %arg12: memref<1x128xf32, #tpu.memory_space<vmem>>, %arg13: memref<128x128xbf16, #tpu.memory_space<vmem>>, %arg14: memref<1x128xf32, #tpu.memory_space<vmem>>, %arg15: memref<2x128xf32, #tpu.memory_space<vmem>>, %arg16: memref<128x128xf32, #tpu.memory_space<vmem>>, %arg17: memref<2x2x128xf32, #tpu.memory_space<vmem>>, %arg18: memref<128x128xbf16, #tpu.memory_space<vmem>>) attributes {dimension_semantics = [#tpu.dimension_semantics<arbitrary>, #tpu.dimension_semantics<arbitrary>], iteration_bounds = array<i64: 2, 1>, scalar_prefetch = 0 : i64, scratch_operands = 3 : i64, tpu.core_type = #tpu.core_type<tc>, window_params = [{transform_indices = @transform_0, window_bounds = array<i64: 1, 128, 128>}, {transform_indices = @transform_1, window_bounds = array<i64: 1, 128, 128>}, {transform_indices = @transform_2, window_bounds = array<i64: 1, 128, 128>}, {transform_indices = @transform_3, window_bounds = array<i64: 1, 128, 128>}, {transform_indices = @transform_4, window_bounds = array<i64: 1, 2, 128>}, {pipeline_mode = #tpu.pipeline_mode<synchronous>, transform_indices = @transform_5, window_bounds = array<i64: 128, 128>}, {pipeline_mode = #tpu.pipeline_mode<synchronous>, transform_indices = @transform_6, window_bounds = array<i64: 1, 128>}, {pipeline_mode = #tpu.pipeline_mode<synchronous>, transform_indices = @transform_7, window_bounds = array<i64: 128, 128>}, {pipeline_mode = #tpu.pipeline_mode<synchronous>, transform_indices = @transform_8, window_bounds = array<i64: 1, 128>}, {pipeline_mode = #tpu.pipeline_mode<synchronous>, transform_indices = @transform_9, window_bounds = array<i64: 2, 128, 128>}, {pipeline_mode = #tpu.pipeline_mode<synchronous>, transform_indices = @transform_10, window_bounds = array<i64: 1, 128>}, {pipeline_mode = #tpu.pipeline_mode<synchronous>, transform_indices = @transform_11, window_bounds = array<i64: 128, 128>}, {pipeline_mode = #tpu.pipeline_mode<synchronous>, transform_indices = @transform_12, window_bounds = array<i64: 1, 128>}, {pipeline_mode = #tpu.pipeline_mode<synchronous>, transform_indices = @transform_13, window_bounds = array<i64: 2, 128>}]} {
    %c0_i32 = arith.constant 0 : i32
    %0 = arith.cmpi eq, %arg1, %c0_i32 : i32
    %1 = arith.extui %0 : i1 to i32
    %c0_i32_0 = arith.constant 0 : i32
    %2 = arith.cmpi ne, %1, %c0_i32_0 : i32
    scf.if %2 {
      %cst_21 = arith.constant 0.000000e+00 : f32
      %28 = vector.broadcast %cst_21 : f32 to vector<128x128xf32>
      %c0_22 = arith.constant 0 : index
      %c0_23 = arith.constant 0 : index
      %29 = vector.load %arg16[%c0_22, %c0_23] : memref<128x128xf32, #tpu.memory_space<vmem>>, vector<128x128xf32>
      tpu.vector_store %arg16[%c0_22, %c0_23], %28 {strides = array<i32>} : memref<128x128xf32, #tpu.memory_space<vmem>>, vector<128x128xf32>,
      %c0_24 = arith.constant 0 : index
      %c0_25 = arith.constant 0 : index
      %c0_26 = arith.constant 0 : index
      %30 = vector.load %arg2[%c0_24, %c0_25, %c0_26] : memref<1x128x128xf32, #tpu.memory_space<vmem>>, vector<1x128x128xf32>
      %31 = vector.shape_cast %30 : vector<1x128x128xf32> to vector<128x128xf32>
      %32 = arith.truncf %31 : vector<128x128xf32> to vector<128x128xbf16>
      %c0_27 = arith.constant 0 : index
      %c0_28 = arith.constant 0 : index
      %33 = vector.load %arg18[%c0_27, %c0_28] : memref<128x128xbf16, #tpu.memory_space<vmem>>, vector<128x128xbf16>
      tpu.vector_store %arg18[%c0_27, %c0_28], %32 {strides = array<i32>} : memref<128x128xbf16, #tpu.memory_space<vmem>>, vector<128x128xbf16>,
    } else {
    }
    %c0 = arith.constant 0 : index
    %c0_1 = arith.constant 0 : index
    %c0_2 = arith.constant 0 : index
    %3 = vector.load %arg4[%c0, %c0_1, %c0_2] : memref<1x128x128xbf16, #tpu.memory_space<vmem>>, vector<1x128x128xbf16>
    %4 = vector.shape_cast %3 : vector<1x128x128xbf16> to vector<128x128xbf16>
    %c0_3 = arith.constant 0 : index
    %c0_4 = arith.constant 0 : index
    %5 = vector.load %arg18[%c0_3, %c0_4] : memref<128x128xbf16, #tpu.memory_space<vmem>>, vector<128x128xbf16>
    %cst = arith.constant dense<0.000000e+00> : vector<128x128xf32>
    %6 = tpu.matmul %4, %5, %cst {dimension_numbers = #tpu.dot_dimension_numbers<[1], [0], [0], [1], [0, 0, 1, 1], [], []>} : vector<128x128xbf16>, vector<128x128xbf16>, vector<128x128xf32> -> vector<128x128xf32>
    %c0_5 = arith.constant 0 : index
    %c0_6 = arith.constant 0 : index
    %c0_7 = arith.constant 0 : index
    %7 = vector.load %arg3[%c0_5, %c0_6, %c0_7] : memref<1x128x128xbf16, #tpu.memory_space<vmem>>, vector<1x128x128xbf16>
    %8 = vector.shape_cast %7 : vector<1x128x128xbf16> to vector<128x128xbf16>
    %9 = arith.extf %8 : vector<128x128xbf16> to vector<128x128xf32>
    %10 = arith.addf %6, %9 : vector<128x128xf32>
    %cst_8 = arith.constant 0.000000e+00 : f32
    %11 = vector.broadcast %cst_8 : f32 to vector<128x128xf32>
    %12 = arith.maximumf %10, %11 : vector<128x128xf32>
    %c0_9 = arith.constant 0 : index
    %c0_10 = arith.constant 0 : index
    %13 = vector.load %arg16[%c0_9, %c0_10] : memref<128x128xf32, #tpu.memory_space<vmem>>, vector<128x128xf32>
    %c0_11 = arith.constant 0 : index
    %c0_12 = arith.constant 0 : index
    %c0_13 = arith.constant 0 : index
    %14 = vector.load %arg5[%c0_11, %c0_12, %c0_13] : memref<1x128x128xbf16, #tpu.memory_space<vmem>>, vector<1x128x128xbf16>
    %15 = vector.shape_cast %14 : vector<1x128x128xbf16> to vector<128x128xbf16>
    %16 = arith.truncf %12 : vector<128x128xf32> to vector<128x128xbf16>
    %cst_14 = arith.constant dense<0.000000e+00> : vector<128x128xf32>
    %17 = tpu.matmul %15, %16, %cst_14 {dimension_numbers = #tpu.dot_dimension_numbers<[1], [0], [0], [1], [0, 0, 1, 1], [], []>} : vector<128x128xbf16>, vector<128x128xbf16>, vector<128x128xf32> -> vector<128x128xf32>
    %18 = arith.addf %13, %17 : vector<128x128xf32>
    %c0_15 = arith.constant 0 : index
    %c0_16 = arith.constant 0 : index
    %19 = vector.load %arg16[%c0_15, %c0_16] : memref<128x128xf32, #tpu.memory_space<vmem>>, vector<128x128xf32>
    tpu.vector_store %arg16[%c0_15, %c0_16], %18 {strides = array<i32>} : memref<128x128xf32, #tpu.memory_space<vmem>>, vector<128x128xf32>,
    %c0_i32_17 = arith.constant 0 : i32
    %20 = arith.cmpi eq, %arg1, %c0_i32_17 : i32
    %21 = arith.extui %20 : i1 to i32
    %c0_i32_18 = arith.constant 0 : i32
    %22 = arith.cmpi ne, %21, %c0_i32_18 : i32
    scf.if %22 {
      %c0_21 = arith.constant 0 : index
      %c0_22 = arith.constant 0 : index
      %c0_23 = arith.constant 0 : index
      %28 = vector.load %arg2[%c0_21, %c0_22, %c0_23] : memref<1x128x128xf32, #tpu.memory_space<vmem>>, vector<1x128x128xf32>
      %29 = vector.shape_cast %28 : vector<1x128x128xf32> to vector<128x128xf32>
      %cst_24 = arith.constant 1.000000e+00 : f32
      %30 = vector.broadcast %cst_24 : f32 to vector<128x128xf32>
      %31 = arith.mulf %30, %29 : vector<128x128xf32>
      %c0_25 = arith.constant 0 : index
      %c0_26 = arith.constant 0 : index
      %32 = vector.load %arg16[%c0_25, %c0_26] : memref<128x128xf32, #tpu.memory_space<vmem>>, vector<128x128xf32>
      %33 = arith.addf %31, %32 : vector<128x128xf32>
      %34 = arith.truncf %33 : vector<128x128xf32> to vector<128x128xbf16>
      %c0_27 = arith.constant 0 : index
      %c0_28 = arith.constant 0 : index
      %35 = vector.load %arg7[%c0_27, %c0_28] : memref<128x128xbf16, #tpu.memory_space<vmem>>, vector<128x128xbf16>
      %cst_29 = arith.constant dense<0.000000e+00> : vector<128x128xf32>
      %36 = tpu.matmul %34, %35, %cst_29 {dimension_numbers = #tpu.dot_dimension_numbers<[1], [0], [0], [1], [0, 0, 1, 1], [], []>} : vector<128x128xbf16>, vector<128x128xbf16>, vector<128x128xf32> -> vector<128x128xf32>
      %c0_30 = arith.constant 0 : index
      %c0_31 = arith.constant 0 : index
      %37 = vector.load %arg8[%c0_30, %c0_31] : memref<1x128xf32, #tpu.memory_space<vmem>>, vector<1x128xf32>
      %38 = vector.broadcast %37 : vector<1x128xf32> to vector<128x128xf32>
      %39 = arith.addf %36, %38 : vector<128x128xf32>
      %cst_32 = arith.constant 0.000000e+00 : f32
      %40 = vector.broadcast %cst_32 : f32 to vector<128x128xf32>
      %41 = arith.maximumf %39, %40 : vector<128x128xf32>
      %42 = arith.truncf %41 : vector<128x128xf32> to vector<128x128xbf16>
      %c0_33 = arith.constant 0 : index
      %c0_34 = arith.constant 0 : index
      %43 = vector.load %arg9[%c0_33, %c0_34] : memref<128x128xbf16, #tpu.memory_space<vmem>>, vector<128x128xbf16>
      %cst_35 = arith.constant dense<0.000000e+00> : vector<128x128xf32>
      %44 = tpu.matmul %42, %43, %cst_35 {dimension_numbers = #tpu.dot_dimension_numbers<[1], [0], [0], [1], [0, 0, 1, 1], [], []>} : vector<128x128xbf16>, vector<128x128xbf16>, vector<128x128xf32> -> vector<128x128xf32>
      %c0_36 = arith.constant 0 : index
      %c0_37 = arith.constant 0 : index
      %45 = vector.load %arg10[%c0_36, %c0_37] : memref<1x128xf32, #tpu.memory_space<vmem>>, vector<1x128xf32>
      %46 = vector.broadcast %45 : vector<1x128xf32> to vector<128x128xf32>
      %47 = arith.addf %44, %46 : vector<128x128xf32>
      %c0_38 = arith.constant 0 : index
      %c0_39 = arith.constant 0 : index
      %c0_40 = arith.constant 0 : index
      %48 = vector.load %arg6[%c0_38, %c0_39, %c0_40] : memref<1x2x128xf32, #tpu.memory_space<vmem>>, vector<1x2x128xf32>
      %49 = vector.shape_cast %48 : vector<1x2x128xf32> to vector<2x128xf32>
      %cst_41 = arith.constant dense<0.000000e+00> : vector<2x128xf32>
      %50 = tpu.matmul %49, %47, %cst_41 {dimension_numbers = #tpu.dot_dimension_numbers<[1], [0], [0], [1], [0, 0, 1, 1], [], []>} : vector<2x128xf32>, vector<128x128xf32>, vector<2x128xf32> -> vector<2x128xf32>
      %51 = arith.index_cast %arg0 : i32 to index
      %c0_42 = arith.constant 0 : index
      %c0_43 = arith.constant 0 : index
      %52 = vector.load %arg17[%51, %c0_42, %c0_43] : memref<2x2x128xf32, #tpu.memory_space<vmem>>, vector<1x2x128xf32>
      %53 = vector.shape_cast %52 : vector<1x2x128xf32> to vector<2x128xf32>
      %54 = vector.shape_cast %50 : vector<2x128xf32> to vector<1x2x128xf32>
      tpu.vector_store %arg17[%51, %c0_42, %c0_43], %54 {strides = array<i32>} : memref<2x2x128xf32, #tpu.memory_space<vmem>>, vector<1x2x128xf32>,
    } else {
    }
    %c1_i32 = arith.constant 1 : i32
    %23 = arith.cmpi eq, %arg0, %c1_i32 : i32
    %c0_i32_19 = arith.constant 0 : i32
    %24 = arith.cmpi eq, %arg1, %c0_i32_19 : i32
    %25 = arith.andi %23, %24 : i1
    %26 = arith.extui %25 : i1 to i32
    %c0_i32_20 = arith.constant 0 : i32
    %27 = arith.cmpi ne, %26, %c0_i32_20 : i32
    scf.if %27 {
      %c0_21 = arith.constant 0 : index
      %c0_22 = arith.constant 0 : index
      %c0_23 = arith.constant 0 : index
      %28 = vector.load %arg17[%c0_21, %c0_22, %c0_23] : memref<2x2x128xf32, #tpu.memory_space<vmem>>, vector<1x2x128xf32>
      %29 = vector.shape_cast %28 : vector<1x2x128xf32> to vector<2x128xf32>
      %30 = arith.truncf %29 : vector<2x128xf32> to vector<2x128xbf16>
      %c0_24 = arith.constant 0 : index
      %c0_25 = arith.constant 0 : index
      %c0_26 = arith.constant 0 : index
      %31 = vector.load %arg11[%c0_24, %c0_25, %c0_26] : memref<2x128x128xbf16, #tpu.memory_space<vmem>>, vector<1x128x128xbf16>
      %32 = vector.shape_cast %31 : vector<1x128x128xbf16> to vector<128x128xbf16>
      %cst_27 = arith.constant dense<0.000000e+00> : vector<2x128xf32>
      %33 = tpu.matmul %30, %32, %cst_27 {dimension_numbers = #tpu.dot_dimension_numbers<[1], [0], [0], [1], [0, 0, 1, 1], [], []>} : vector<2x128xbf16>, vector<128x128xbf16>, vector<2x128xf32> -> vector<2x128xf32>
      %c1 = arith.constant 1 : index
      %c0_28 = arith.constant 0 : index
      %c0_29 = arith.constant 0 : index
      %34 = vector.load %arg17[%c1, %c0_28, %c0_29] : memref<2x2x128xf32, #tpu.memory_space<vmem>>, vector<1x2x128xf32>
      %35 = vector.shape_cast %34 : vector<1x2x128xf32> to vector<2x128xf32>
      %36 = arith.truncf %35 : vector<2x128xf32> to vector<2x128xbf16>
      %c1_30 = arith.constant 1 : index
      %c0_31 = arith.constant 0 : index
      %c0_32 = arith.constant 0 : index
      %37 = vector.load %arg11[%c1_30, %c0_31, %c0_32] : memref<2x128x128xbf16, #tpu.memory_space<vmem>>, vector<1x128x128xbf16>
      %38 = vector.shape_cast %37 : vector<1x128x128xbf16> to vector<128x128xbf16>
      %cst_33 = arith.constant dense<0.000000e+00> : vector<2x128xf32>
      %39 = tpu.matmul %36, %38, %cst_33 {dimension_numbers = #tpu.dot_dimension_numbers<[1], [0], [0], [1], [0, 0, 1, 1], [], []>} : vector<2x128xbf16>, vector<128x128xbf16>, vector<2x128xf32> -> vector<2x128xf32>
      %40 = arith.addf %33, %39 : vector<2x128xf32>
      %c0_34 = arith.constant 0 : index
      %c0_35 = arith.constant 0 : index
      %41 = vector.load %arg12[%c0_34, %c0_35] : memref<1x128xf32, #tpu.memory_space<vmem>>, vector<1x128xf32>
      %42 = vector.broadcast %41 : vector<1x128xf32> to vector<2x128xf32>
      %43 = arith.addf %40, %42 : vector<2x128xf32>
      %cst_36 = arith.constant 0.000000e+00 : f32
      %44 = vector.broadcast %cst_36 : f32 to vector<2x128xf32>
      %45 = arith.maximumf %43, %44 : vector<2x128xf32>
      %46 = arith.truncf %45 : vector<2x128xf32> to vector<2x128xbf16>
      %c0_37 = arith.constant 0 : index
      %c0_38 = arith.constant 0 : index
      %47 = vector.load %arg13[%c0_37, %c0_38] : memref<128x128xbf16, #tpu.memory_space<vmem>>, vector<128x128xbf16>
      %cst_39 = arith.constant dense<0.000000e+00> : vector<2x128xf32>
      %48 = tpu.matmul %46, %47, %cst_39 {dimension_numbers = #tpu.dot_dimension_numbers<[1], [0], [0], [1], [0, 0, 1, 1], [], []>} : vector<2x128xbf16>, vector<128x128xbf16>, vector<2x128xf32> -> vector<2x128xf32>
      %c0_40 = arith.constant 0 : index
      %c0_41 = arith.constant 0 : index
      %49 = vector.load %arg14[%c0_40, %c0_41] : memref<1x128xf32, #tpu.memory_space<vmem>>, vector<1x128xf32>
      %50 = vector.broadcast %49 : vector<1x128xf32> to vector<2x128xf32>
      %51 = arith.addf %48, %50 : vector<2x128xf32>
      %c0_42 = arith.constant 0 : index
      %c0_43 = arith.constant 0 : index
      %52 = vector.load %arg15[%c0_42, %c0_43] : memref<2x128xf32, #tpu.memory_space<vmem>>, vector<2x128xf32>
      tpu.vector_store %arg15[%c0_42, %c0_43], %51 {strides = array<i32>} : memref<2x128xf32, #tpu.memory_space<vmem>>, vector<2x128xf32>,
    } else {
    }
    return
  }
  func.func @transform_0(%arg0: i32, %arg1: i32) -> (i32, i32, i32) {
    %c0_i32 = arith.constant 0 : i32
    %c0_i32_0 = arith.constant 0 : i32
    %c0_i32_1 = arith.constant 0 : i32
    return %arg0, %c0_i32, %c0_i32_0 : i32, i32, i32
  }
  func.func @transform_1(%arg0: i32, %arg1: i32) -> (i32, i32, i32) {
    %c0_i32 = arith.constant 0 : i32
    %c0_i32_0 = arith.constant 0 : i32
    return %arg0, %arg1, %c0_i32 : i32, i32, i32
  }
  func.func @transform_2(%arg0: i32, %arg1: i32) -> (i32, i32, i32) {
    %c0_i32 = arith.constant 0 : i32
    %c0_i32_0 = arith.constant 0 : i32
    return %arg0, %arg1, %c0_i32 : i32, i32, i32
  }
  func.func @transform_3(%arg0: i32, %arg1: i32) -> (i32, i32, i32) {
    %c0_i32 = arith.constant 0 : i32
    %c0_i32_0 = arith.constant 0 : i32
    return %arg0, %c0_i32, %arg1 : i32, i32, i32
  }
  func.func @transform_4(%arg0: i32, %arg1: i32) -> (i32, i32, i32) {
    %c0_i32 = arith.constant 0 : i32
    %c0_i32_0 = arith.constant 0 : i32
    %c0_i32_1 = arith.constant 0 : i32
    return %arg0, %c0_i32, %c0_i32_0 : i32, i32, i32
  }
  func.func @transform_5(%arg0: i32, %arg1: i32) -> (i32, i32) {
    %c0_i32 = arith.constant 0 : i32
    %c0_i32_0 = arith.constant 0 : i32
    %c0_i32_1 = arith.constant 0 : i32
    return %c0_i32, %c0_i32_0 : i32, i32
  }
  func.func @transform_6(%arg0: i32, %arg1: i32) -> (i32, i32) {
    %c0_i32 = arith.constant 0 : i32
    %c0_i32_0 = arith.constant 0 : i32
    %c0_i32_1 = arith.constant 0 : i32
    return %c0_i32, %c0_i32_0 : i32, i32
  }
  func.func @transform_7(%arg0: i32, %arg1: i32) -> (i32, i32) {
    %c0_i32 = arith.constant 0 : i32
    %c0_i32_0 = arith.constant 0 : i32
    %c0_i32_1 = arith.constant 0 : i32
    return %c0_i32, %c0_i32_0 : i32, i32
  }
  func.func @transform_8(%arg0: i32, %arg1: i32) -> (i32, i32) {
    %c0_i32 = arith.constant 0 : i32
    %c0_i32_0 = arith.constant 0 : i32
    %c0_i32_1 = arith.constant 0 : i32
    return %c0_i32, %c0_i32_0 : i32, i32
  }
  func.func @transform_9(%arg0: i32, %arg1: i32) -> (i32, i32, i32) {
    %c0_i32 = arith.constant 0 : i32
    %c0_i32_0 = arith.constant 0 : i32
    %c0_i32_1 = arith.constant 0 : i32
    %c0_i32_2 = arith.constant 0 : i32
    return %c0_i32, %c0_i32_0, %c0_i32_1 : i32, i32, i32
  }
  func.func @transform_10(%arg0: i32, %arg1: i32) -> (i32, i32) {
    %c0_i32 = arith.constant 0 : i32
    %c0_i32_0 = arith.constant 0 : i32
    %c0_i32_1 = arith.constant 0 : i32
    return %c0_i32, %c0_i32_0 : i32, i32
  }
  func.func @transform_11(%arg0: i32, %arg1: i32) -> (i32, i32) {
    %c0_i32 = arith.constant 0 : i32
    %c0_i32_0 = arith.constant 0 : i32
    %c0_i32_1 = arith.constant 0 : i32
    return %c0_i32, %c0_i32_0 : i32, i32
  }
  func.func @transform_12(%arg0: i32, %arg1: i32) -> (i32, i32) {
    %c0_i32 = arith.constant 0 : i32
    %c0_i32_0 = arith.constant 0 : i32
    %c0_i32_1 = arith.constant 0 : i32
    return %c0_i32, %c0_i32_0 : i32, i32
  }
  func.func @transform_13(%arg0: i32, %arg1: i32) -> (i32, i32) {
    %c0_i32 = arith.constant 0 : i32
    %c0_i32_0 = arith.constant 0 : i32
    %c0_i32_1 = arith.constant 0 : i32
    return %c0_i32, %c0_i32_0 : i32, i32
  }
}

</mosaic_0001>

<bundles_post_ra>
// kernel: tpu_custom_call.1
= control target key start
LH: loop header
LB: loop body
LE: loop exit
PB: predicated region body
PF: predicated region fallthrough
CT: control target
= control target key end

     0   :  { %s3832_s0 = inlined_call_operand.hbm [shape: f32[2,128,128], index: 0, kind: input, shape index: {}]   ;;  %s3833_s1 = inlined_call_operand.hbm [shape: bf16[2,128,128], index: 1, kind: input, shape index: {}]   ;;  %s3834_s2 = inlined_call_operand.hbm [shape: bf16[2,128,128], index: 2, kind: input, shape index: {}]   ;;  %s3835_s3 = inlined_call_operand.hbm [shape: bf16[2,128,128], index: 3, kind: input, shape index: {}]   ;;  %s3836_s4 = inlined_call_operand.vmem [shape: f32[2,2,128], index: 4, kind: input, shape index: {}]   ;;  %s3837_s5 = inlined_call_operand.hbm [shape: bf16[128,128], index: 5, kind: input, shape index: {}]   ;;  %s3838_s6 = inlined_call_operand.vmem [shape: f32[1,128], index: 6, kind: input, shape index: {}]   ;;  %s3839_s7 = inlined_call_operand.hbm [shape: bf16[128,128], index: 7, kind: input, shape index: {}]   ;;  %s3840_s8 = inlined_call_operand.vmem [shape: f32[1,128], index: 8, kind: input, shape index: {}]   ;;  %s3841_s9 = inlined_call_operand.hbm [shape: bf16[2,128,128], index: 9, kind: input, shape index: {}]   ;;  %s3842_s10 = inlined_call_operand.vmem [shape: f32[1,128], index: 10, kind: input, shape index: {}]   ;;  %s3843_s11 = inlined_call_operand.hbm [shape: bf16[128,128], index: 11, kind: input, shape index: {}]   ;;  %s3844_s12 = inlined_call_operand.vmem [shape: f32[1,128], index: 12, kind: input, shape index: {}]   ;;  %s3845_s13 = inlined_call_operand.hbm [shape: f32[2,128], index: 13, kind: output, shape index: {}]  }
   0x1   :  { %3871 = sst [smem:[#allocation34_spill]] %s3833_s1 }
   0x2   :  { %3872 = sst [smem:[#allocation35_spill]] %s3836_s4 }
   0x3   :  { %3873 = sst [smem:[#allocation36_spill]] %s3837_s5 }
   0x4   :  { %3874 = sst [smem:[#allocation37_spill]] %s3838_s6 }
   0x5   :  { %3875 = sst [smem:[#allocation38_spill]] %s3839_s7 }
   0x6   :  { %3876 = sst [smem:[#allocation39_spill]] %s3840_s8 }
   0x7   :  { %3877 = sst [smem:[#allocation40_spill]] %s3842_s10 }
   0x8   :  { %3878 = sst [smem:[#allocation41_spill]] %s3844_s12 }
   0x9   :  { %3879 = sst [smem:[#allocation42_spill]] %s3845_s13 }
   0xa   :  { %18 = vsyncpa [#allocation6], 0 }
   0xb   :  { %20 = vsyncpa [#allocation6 + $0x1], 0 }
   0xc   :  { %21 = vsyncpa [#allocation9], 0 }
   0xd   :  { %23 = vsyncpa [#allocation9 + $0x1], 0 }
   0xe   :  { %24 = vsyncpa [#allocation12], 0 }
   0xf   :  { %26 = vsyncpa [#allocation12 + $0x1], 0 }
  0x10   :  { %27 = vsyncpa [#allocation15], 0 }
  0x11   :  { %28 = vsyncpa [#allocation18], 0 }
  0x12   :  { %29 = vsyncpa [#allocation7], 0  ;;  %s3276_s25 = smov 0   ;;  %s3278_s26 = smov 0  }
  0x13   :  { %s3280_s27 = smov 0   ;;  %s3282_s28 = smov 0  }
  0x14   :  { %s3284_s29 = smov 0   ;;  %s3286_s30 = smov 0  }
  0x15 LB: > { %3880 = sst [smem:[#allocation27_spill]] %s3170_s26  ;;  %s3305_s14 = sadd.s32 4294967295, %s3186_s30   ;;  %s3186_s30 = sphi %s3286_s30, %s35_s30   ;;  %s3182_s29 = sphi %s3284_s29, %s3928_s29   ;;  %s3178_s28 = sphi %s3282_s28, %s3927_s28   ;;  %s3174_s27 = sphi %s3280_s27, %s3925_s27   ;;  %s3170_s26 = sphi %s3278_s26, %s3924_s26   ;;  %s3166_s25 = sphi %s3276_s25, %s3923_s25  }
  0x16   : > { %3881 = sst [smem:[#allocation28_spill]] %s3174_s27  ;;  %p67_p0 = scmp.ne.s32.totalorder %s3170_s26, %s3166_s25 }
  0x17   : > { %3882 = sst [smem:[#allocation29_spill]] %s3178_s28  ;;  %p3847_p1 = scmp.eq.s32.totalorder %s3305_s14, 0 }
  0x18   : > { %3883 = sst [smem:[#allocation30_spill]] %s3305_s14  ;;  %p2178_p2 = scmp.ge.s32.totalorder %s3186_s30, 1 }
  0x19   : > { %p377_p3 = scmp.lt.s32.totalorder %s3186_s30, 3  ;;  %p3313_p4 = por %p3847_p1, %p67_p0 }
  0x1a   : > { %s3188_s17 = smov [#allocation13]   ;;  %s3189_s20 = smov [#allocation14]  }
  0x1b   : > { %s3884_s15 = scalar_select %p3313_p4, 1, 0 }
  0x1c   : > { %p3317_p5 = pnand %p2178_p2, %p377_p3  ;;  %s389_s18 = sshll.u32 %s3188_s17, 4  ;;  %s390_s18 = int_to_ptr.vmem [resolvable:$true] %s389_s18 }
  0x1d   : > { %3885 = sst [smem:[#allocation31_spill]] %s3884_s15  ;;  %s405_s21 = sshll.u32 %s3189_s20, 4  ;;  %s3329_s21 = int_to_ptr.vmem [resolvable:$true] %s405_s21 }
  0x1e   : > { %s3886_s16 = scalar_select %p3317_p5, 1, 0 }
  0x1f   : > { %p2699_p6 = pneg %p3317_p5  ;;  %s3888_s5 = sld [smem:[#allocation36_spill]] }
  0x21   : > { %p3325_p7 = pnand %p2699_p6, %p3847_p1 }
  0x23   : > { %s3887_s19 = scalar_select %p3325_p7, 1, 0 }
  0x24   : > { %p3339_p9 = pneg %p3325_p7 }
  0x25   : > { %s2854_s24 = scalar_lea.hbm %s3888_s5, 1024 }
  0x26   : > { %p2855_p8 = scmp.ne.s32.totalorder %s3888_s5, %s2854_s24  ;;  %p2861_p12 = scmp.lt.u32.totalorder %s2854_s24, %s3888_s5 }
  0x27   : > { %s3889_s17 = scalar_select %p3339_p9, 1, 0 }
  0x28   : > { %p2857_p10 = pnand %p3339_p9, %p2855_p8 }
  0x2a   : > { %p2858_p11 = pneg %p2857_p10 }
  0x2c   : > { %p2863_p13 = pnand %p2861_p12, %p2858_p11 }
  0x2e   : > { %2866 = shalt.err (!%p2863_p13)
}
  0x2f   : > { %s2867_s22 = scalar_lea.vmem %s390_s18, 1024  ;;  %p2875_p6 = scmp.lt.s32.totalorder %s390_s18, %s390_s18 }
  0x30   : > { %p2868_p0 = scmp.ne.s32.totalorder %s390_s18, %s2867_s22  ;;  %p2876_p1 = scmp.lt.s32.totalorder %s2867_s22, %s2867_s22 }
  0x32   : > { %p2870_p2 = pnand %p2868_p0, %p3339_p9  ;;  %p2877_p4 = por %p2876_p1, %p2875_p6 }
  0x34   : > { %p2871_p3 = pneg %p2870_p2 }
  0x36   : > { %p2878_p5 = pnand %p2877_p4, %p2871_p3 }
  0x38   : > { %2881 = shalt.err (!%p2878_p5)
}
  0x39   : > { %s3851_s13 = smov 64   ;;  %s3853_s23 = smov 4  }
  0x3a   : > { %2702 = dma.hbm_to_vmem [thread:$0]  (!%p3325_p7), %s3888_s5, 1024, %s390_s18, [#allocation12], %s3851_s13, %s3851_s13, %s3853_s23  }
  0x3b   : > { %s3890_s7 = sld [smem:[#allocation38_spill]] }
  0x41   : > { %s2882_s10 = scalar_lea.hbm %s3890_s7, 1024 }
  0x42   : > { %p2883_p1 = scmp.ne.s32.totalorder %s3890_s7, %s2882_s10  ;;  %p2889_p8 = scmp.lt.u32.totalorder %s2882_s10, %s3890_s7 }
  0x44   : > { %p2885_p4 = pnand %p2883_p1, %p3339_p9 }
  0x46   : > { %p2886_p5 = pneg %p2885_p4 }
  0x48   : > { %p2891_p10 = pnand %p2889_p8, %p2886_p5 }
  0x4a   : > { %2894 = shalt.err (!%p2891_p10)
}
  0x4b   : > { %s2895_s18 = scalar_lea.vmem %s3329_s21, 1024  ;;  %p2903_p0 = scmp.lt.s32.totalorder %s3329_s21, %s3329_s21 }
  0x4c   : > { %p2896_p11 = scmp.ne.s32.totalorder %s3329_s21, %s2895_s18  ;;  %p2904_p2 = scmp.lt.s32.totalorder %s2895_s18, %s2895_s18 }
  0x4e   : > { %p2898_p12 = pnand %p2896_p11, %p3339_p9  ;;  %p2905_p3 = por %p2904_p2, %p2903_p0 }
  0x50   : > { %p2899_p13 = pneg %p2898_p12 }
  0x52   : > { %p2906_p6 = pnand %p2905_p3, %p2899_p13 }
  0x54   : > { %2909 = shalt.err (!%p2906_p6)
}
  0x55   : > { %2705 = dma.hbm_to_vmem [thread:$0]  (!%p3325_p7), %s3890_s7, 1024, %s3329_s21, [#allocation15], %s3851_s13, %s3851_s13, %s3853_s23  }
  0x56   : > { %s47_s10 = sadd.s32 1, %s3182_s29  ;;  %s54_s28 = sadd.s32 1, %s3174_s27 }
  0x57   : > { %p49_p1 = scmp.ge.s32.totalorder %s47_s10, 2  ;;  %p61_p4 = scmp.ne.s32.totalorder %s3174_s27, %s3170_s26 }
  0x58   : > { %p62_p5 = scmp.eq.s32.totalorder %s3186_s30, 0  ;;  %p2729_p8 = scmp.lt.s32.totalorder %s3186_s30, 2 }
  0x59   : > { %s3930_s10 = smov (%p49_p1, %s47_s10), 0  ;;  %s3393_s12 = sand.u32 1, %s3174_s27  }
  0x5a   : > { %3891 = sst [smem:[#allocation32_spill]] %s3930_s10  ;;  %p63_p10 = por %p62_p5, %p61_p4 }
  0x5b   : > { %s51_s24 = ssub.s32 %s3182_s29, %s3930_s10  ;;  %s3403_s20 = sshll.u32 %s3393_s12, 6 }
  0x5c   : > { %p52_p11 = scmp.eq.s32.totalorder %s51_s24, 0  ;;  %p3398_p12 = pnand %p2729_p8, %p63_p10 }
  0x5d   : > { %s3409_s18 = sshll.u32 %s3182_s29, 10  ;;  %s479_s4 = scalar_lea.vmem [#allocation8], %s3403_s20 }
  0x5e   : > { %s3892_s21 = scalar_select %p3398_p12, 1, 0 }
  0x5f   : > { %s3406_s22 = scalar_select %p52_p11, %s3174_s27, %s54_s28  }
  0x60   : > { %s488_s8 = sshll.u32 %s479_s4, 4  ;;  %s3894_s1 = sld [smem:[#allocation34_spill]]  ;;  %s3418_s8 = int_to_ptr.vmem [resolvable:$true] %s488_s8 }
  0x61   : > { %3893 = sst [smem:[#allocation33_spill]] %s3406_s22  ;;  %s3895_s24 = sand.u32 1, %s3186_s30  }
  0x62   : > { %s3422_s5 = scalar_lea.sflag [#allocation9], %s3895_s24  ;;  %p3428_p0 = pneg %p3398_p12 }
  0x64   : > { %s3896_s7 = scalar_select %p3428_p0, 1, 0 }
  0x66   : > { %s3416_s25 = scalar_lea.hbm %s3894_s1, %s3409_s18  ;;  %s2915_s4 = scalar_lea.hbm %s3894_s1, 2048 }
  0x67   : > { %s2910_s28 = scalar_lea.hbm %s3416_s25, 1024  ;;  %p2916_p6 = scmp.lt.u32.totalorder %s3416_s25, %s3894_s1 }
  0x68   : > { %p2911_p13 = scmp.ne.s32.totalorder %s3416_s25, %s2910_s28  ;;  %p2917_p1 = scmp.lt.u32.totalorder %s2915_s4, %s2910_s28 }
  0x69   : > { %p2919_p5 = scmp.lt.u32.totalorder %s2910_s28, %s3416_s25 }
  0x6a   : > { %p2913_p2 = pnand %p3428_p0, %p2911_p13  ;;  %p2918_p4 = por %p2917_p1, %p2916_p6 }
  0x6c   : > { %p2914_p3 = pneg %p2913_p2  ;;  %p2920_p8 = por %p2919_p5, %p2918_p4 }
  0x6e   : > { %p2921_p10 = pnand %p2920_p8, %p2914_p3 }
  0x70   : > { %2924 = shalt.err (!%p2921_p10)
}
  0x71   : > { %s2925_s24 = scalar_lea.vmem %s3418_s8, 1024  ;;  %s3192_s13 = smov [#allocation8]  }
  0x72   : > { %p2926_p11 = scmp.ne.s32.totalorder %s3418_s8, %s2925_s24  ;;  %s2930_s23 = sshll.u32 %s3192_s13, 4  ;;  %s2931_s23 = int_to_ptr.vmem [resolvable:$false] %s2930_s23 }
  0x73   : > { %s2932_s10 = scalar_lea.vmem %s2931_s23, 2048  ;;  %p2933_p7 = scmp.lt.s32.totalorder %s3418_s8, %s2931_s23 }
  0x74   : > { %p2928_p13 = pnand %p2926_p11, %p3428_p0  ;;  %p2934_p9 = scmp.lt.s32.totalorder %s2932_s10, %s2925_s24 }
  0x76   : > { %p2929_p2 = pneg %p2928_p13  ;;  %p2935_p6 = por %p2934_p9, %p2933_p7 }
  0x78   : > { %p2936_p1 = pnand %p2935_p6, %p2929_p2 }
  0x7a   : > { %2939 = shalt.err (!%p2936_p1)
}
  0x7b   : > { %s3897_s22 = smov 4   ;;  %s3898_s28 = smov 64  }
  0x7c   : > { %2718 = dma.hbm_to_vmem [thread:$0]  (!%p3398_p12), %s3416_s25, 1024, %s3418_s8, %s3422_s5, %s3898_s28, %s3898_s28, %s3897_s22  }
  0x7d   : > { %s3193_s4 = smov [#allocation16]   ;;  %s3194_s13 = smov [#allocation17]  }
  0x7e   : > { %s421_s1 = sshll.u32 %s3193_s4, 4  ;;  %s437_s27 = sshll.u32 %s3194_s13, 4  ;;  %s422_s1 = int_to_ptr.vmem [resolvable:$true] %s421_s1  ;;  %s438_s27 = int_to_ptr.vmem [resolvable:$true] %s437_s27 }
  0x7f   : > { %s2940_s10 = scalar_lea.hbm %s3841_s9, 2048  ;;  %p3899_p9 = scmp.ne.s32.totalorder %s3889_s17, 0 }
  0x80   : > { %p2941_p7 = scmp.ne.s32.totalorder %s3841_s9, %s2940_s10  ;;  %p2947_p5 = scmp.lt.u32.totalorder %s2940_s10, %s3841_s9 }
  0x82   : > { %p2943_p3 = pnand %p2941_p7, %p3899_p9 }
  0x84   : > { %p2944_p4 = pneg %p2943_p3 }
  0x86   : > { %p2949_p8 = pnand %p2947_p5, %p2944_p4 }
  0x88   : > { %2952 = shalt.err (!%p2949_p8)
}
  0x89   : > { %s2953_s25 = scalar_lea.vmem %s422_s1, 2048  ;;  %p2961_p2 = scmp.lt.s32.totalorder %s422_s1, %s422_s1 }
  0x8a   : > { %p2954_p10 = scmp.ne.s32.totalorder %s422_s1, %s2953_s25  ;;  %p2962_p6 = scmp.lt.s32.totalorder %s2953_s25, %s2953_s25 }
  0x8c   : > { %p2956_p11 = pnand %p2954_p10, %p3899_p9  ;;  %p2963_p1 = por %p2962_p6, %p2961_p2 }
  0x8e   : > { %p2957_p13 = pneg %p2956_p11 }
  0x90   : > { %p2964_p12 = pnand %p2963_p1, %p2957_p13 }
  0x92   : > { %2967 = shalt.err (!%p2964_p12)
}
  0x93   : > { %p3900_p7 = scmp.ne.s32.totalorder %s3887_s19, 0  ;;  %s2968_s8 = scalar_lea.hbm %s3843_s11, 1024 }
  0x94   : > { %p2969_p3 = scmp.ne.s32.totalorder %s3843_s11, %s2968_s8  ;;  %p2975_p5 = scmp.lt.u32.totalorder %s2968_s8, %s3843_s11 }
  0x95   : > { %2708 = dma.hbm_to_vmem [thread:$0]  (!%p3900_p7), %s3841_s9, 2048, %s422_s1, [#allocation15], %s3898_s28, %s3898_s28, %s3897_s22  }
  0x96   : > { %p2971_p12 = pnand %p2969_p3, %p3899_p9 }
  0x98   : > { %p2972_p4 = pneg %p2971_p12 }
  0x9a   : > { %p2977_p8 = pnand %p2975_p5, %p2972_p4 }
  0x9c   : > { %2980 = shalt.err (!%p2977_p8)
}
  0x9d   : > { %s2981_s10 = scalar_lea.vmem %s438_s27, 1024  ;;  %p2989_p2 = scmp.lt.s32.totalorder %s438_s27, %s438_s27 }
  0x9e   : > { %p2982_p10 = scmp.ne.s32.totalorder %s438_s27, %s2981_s10  ;;  %p2990_p6 = scmp.lt.s32.totalorder %s2981_s10, %s2981_s10 }
  0xa0   : > { %p2984_p11 = pnand %p2982_p10, %p3899_p9  ;;  %p2991_p1 = por %p2990_p6, %p2989_p2 }
  0xa2   : > { %p2985_p13 = pneg %p2984_p11 }
  0xa4   : > { %p2992_p0 = pnand %p2991_p1, %p2985_p13 }
  0xa6   : > { %2995 = shalt.err (!%p2992_p0)
}
  0xa7   : > { %2711 = dma.hbm_to_vmem [thread:$0]  (!%p3900_p7), %s3843_s11, 1024, %s438_s27, [#allocation18], %s3898_s28, %s3898_s28, %s3897_s22  }
  0xa8   : > { %s2184_s17 = sshll.u32 %s3393_s12, 7  ;;  %s2272_s6 = sshll.u32 %s3182_s29, 11 }
  0xa9   : > { %s3502_s15 = scalar_lea.hbm %s3832_s0, %s2272_s6  ;;  %s458_s19 = scalar_lea.vmem [#allocation5], %s2184_s17 }
  0xaa   : > { %s465_s8 = sshll.u32 %s458_s19, 4  ;;  %s455_s4 = scalar_lea.sflag [#allocation6], %s3393_s12  ;;  %s3504_s8 = int_to_ptr.vmem [resolvable:$true] %s465_s8 }
  0xab   : > { %s2996_s13 = scalar_lea.hbm %s3502_s15, 2048  ;;  %p3901_p9 = scmp.ne.s32.totalorder %s3896_s7, 0 }
  0xac   : > { %p2997_p0 = scmp.ne.s32.totalorder %s3502_s15, %s2996_s13  ;;  %s3001_s24 = scalar_lea.hbm %s3832_s0, 4096 }
  0xad   : > { %p3002_p12 = scmp.lt.u32.totalorder %s3502_s15, %s3832_s0  ;;  %p3003_p4 = scmp.lt.u32.totalorder %s3001_s24, %s2996_s13 }
  0xae   : > { %p2999_p7 = pnand %p2997_p0, %p3901_p9  ;;  %p3005_p8 = scmp.lt.u32.totalorder %s2996_s13, %s3502_s15 }
  0xaf   : > { %p3004_p5 = por %p3003_p4, %p3002_p12 }
  0xb0   : > { %p3000_p3 = pneg %p2999_p7 }
  0xb1   : > { %p3006_p10 = por %p3005_p8, %p3004_p5 }
  0xb3   : > { %p3007_p11 = pnand %p3006_p10, %p3000_p3 }
  0xb5   : > { %3010 = shalt.err (!%p3007_p11)
}
  0xb6   : > { %s3011_s25 = scalar_lea.vmem %s3504_s8, 2048  ;;  %s3195_s17 = smov [#allocation5]  }
  0xb7   : > { %p3012_p13 = scmp.ne.s32.totalorder %s3504_s8, %s3011_s25  ;;  %s3016_s6 = sshll.u32 %s3195_s17, 4  ;;  %s3017_s6 = int_to_ptr.vmem [resolvable:$false] %s3016_s6 }
  0xb8   : > { %s3018_s26 = scalar_lea.vmem %s3017_s6, 4096  ;;  %p3019_p1 = scmp.lt.s32.totalorder %s3504_s8, %s3017_s6 }
  0xb9   : > { %p3014_p2 = pnand %p3012_p13, %p3901_p9  ;;  %p3020_p0 = scmp.lt.s32.totalorder %s3018_s26, %s3011_s25 }
  0xbb   : > { %p3015_p6 = pneg %p3014_p2  ;;  %p3021_p7 = por %p3020_p0, %p3019_p1 }
  0xbd   : > { %p3022_p12 = pnand %p3021_p7, %p3015_p6 }
  0xbf   : > { %3025 = shalt.err (!%p3022_p12)
}
  0xc0   : > { %s3196_s14 = smov 128   ;;  %s3197_s19 = smov 8  }
  0xc1   : > { %p3902_p3 = scmp.ne.s32.totalorder %s3892_s21, 0  ;;  %s3534_s23 = scalar_lea.hbm %s3834_s2, %s3409_s18 }
  0xc2   : > { %s502_s24 = scalar_lea.vmem [#allocation10], %s3403_s20  ;;  %s3543_s17 = scalar_lea.hbm %s3835_s3, %s3409_s18 }
  0xc3   : > { %2715 = dma.hbm_to_vmem [thread:$0]  (!%p3902_p3), %s3502_s15, 2048, %s3504_s8, %s455_s4, %s3196_s14, %s3196_s14, %s3197_s19  }
  0xc4   : > { %s511_s10 = sshll.u32 %s502_s24, 4  ;;  %s3026_s12 = scalar_lea.hbm %s3534_s23, 1024  ;;  %s3537_s10 = int_to_ptr.vmem [resolvable:$true] %s511_s10 }
  0xc5   : > { %p3027_p4 = scmp.ne.s32.totalorder %s3534_s23, %s3026_s12  ;;  %s3031_s4 = scalar_lea.hbm %s3834_s2, 2048 }
  0xc6   : > { %p3032_p10 = scmp.lt.u32.totalorder %s3534_s23, %s3834_s2  ;;  %p3033_p11 = scmp.lt.u32.totalorder %s3031_s4, %s3026_s12 }
  0xc7   : > { %p3029_p5 = pnand %p3027_p4, %p3901_p9  ;;  %p3035_p2 = scmp.lt.u32.totalorder %s3026_s12, %s3534_s23 }
  0xc8   : > { %p3034_p13 = por %p3033_p11, %p3032_p10 }
  0xc9   : > { %p3030_p8 = pneg %p3029_p5 }
  0xca   : > { %p3036_p6 = por %p3035_p2, %p3034_p13 }
  0xcc   : > { %p3037_p1 = pnand %p3036_p6, %p3030_p8 }
  0xce   : > { %3040 = shalt.err (!%p3037_p1)
}
  0xcf   : > { %s3041_s18 = scalar_lea.vmem %s3537_s10, 1024  ;;  %s3198_s14 = smov [#allocation10]  }
  0xd0   : > { %p3042_p0 = scmp.ne.s32.totalorder %s3537_s10, %s3041_s18  ;;  %s3046_s19 = sshll.u32 %s3198_s14, 4  ;;  %s3047_s19 = int_to_ptr.vmem [resolvable:$false] %s3046_s19 }
  0xd1   : > { %s3048_s13 = scalar_lea.vmem %s3047_s19, 2048  ;;  %p3049_p4 = scmp.lt.s32.totalorder %s3537_s10, %s3047_s19 }
  0xd2   : > { %p3044_p7 = pnand %p3042_p0, %p3901_p9  ;;  %p3050_p5 = scmp.lt.s32.totalorder %s3048_s13, %s3041_s18 }
  0xd4   : > { %p3045_p12 = pneg %p3044_p7  ;;  %p3051_p10 = por %p3050_p5, %p3049_p4 }
  0xd6   : > { %p3052_p11 = pnand %p3051_p10, %p3045_p12 }
  0xd8   : > { %3055 = shalt.err (!%p3052_p11)
}
  0xd9   : > { %2721 = dma.hbm_to_vmem [thread:$0]  (!%p3902_p3), %s3534_s23, 1024, %s3537_s10, %s3422_s5, %s3898_s28, %s3898_s28, %s3897_s22  }
  0xda   : > { %s525_s27 = scalar_lea.vmem [#allocation11], %s3403_s20  ;;  %s3903_s1 = sand.u32 1, %s3186_s30  }
  0xdb   : > { %s533_s24 = sshll.u32 %s525_s27, 4  ;;  %s3575_s25 = scalar_lea.sflag [#allocation12], %s3903_s1  ;;  %s3571_s24 = int_to_ptr.vmem [resolvable:$true] %s533_s24 }
  0xdc   : > { %s3056_s12 = scalar_lea.hbm %s3543_s17, 1024  ;;  %s3061_s4 = scalar_lea.hbm %s3835_s3, 2048 }
  0xdd   : > { %p3057_p8 = scmp.ne.s32.totalorder %s3543_s17, %s3056_s12  ;;  %p3062_p6 = scmp.lt.u32.totalorder %s3543_s17, %s3835_s3 }
  0xde   : > { %p3063_p1 = scmp.lt.u32.totalorder %s3061_s4, %s3056_s12  ;;  %p3065_p7 = scmp.lt.u32.totalorder %s3056_s12, %s3543_s17 }
  0xdf   : > { %p3059_p13 = pnand %p3057_p8, %p3901_p9 }
  0xe0   : > { %p3064_p0 = por %p3063_p1, %p3062_p6 }
  0xe1   : > { %p3060_p2 = pneg %p3059_p13 }
  0xe2   : > { %p3066_p12 = por %p3065_p7, %p3064_p0 }
  0xe4   : > { %p3067_p4 = pnand %p3066_p12, %p3060_p2 }
  0xe6   : > { %3070 = shalt.err (!%p3067_p4)
}
  0xe7   : > { %s3071_s5 = scalar_lea.vmem %s3571_s24, 1024  ;;  %s3199_s20 = smov [#allocation11]  }
  0xe8   : > { %p3072_p5 = scmp.ne.s32.totalorder %s3571_s24, %s3071_s5  ;;  %s3076_s23 = sshll.u32 %s3199_s20, 4  ;;  %s3077_s23 = int_to_ptr.vmem [resolvable:$false] %s3076_s23 }
  0xe9   : > { %s3078_s10 = scalar_lea.vmem %s3077_s23, 2048  ;;  %p3079_p8 = scmp.lt.s32.totalorder %s3571_s24, %s3077_s23 }
  0xea   : > { %p3074_p10 = pnand %p3072_p5, %p3901_p9  ;;  %p3080_p13 = scmp.lt.s32.totalorder %s3078_s10, %s3071_s5 }
  0xec   : > { %p3075_p11 = pneg %p3074_p10  ;;  %p3081_p6 = por %p3080_p13, %p3079_p8 }
  0xee   : > { %p3082_p1 = pnand %p3081_p6, %p3075_p11 }
  0xf0   : > { %3085 = shalt.err (!%p3082_p1)
}
  0xf1   : > { %2724 = dma.hbm_to_vmem [thread:$0]  (!%p3902_p3), %s3543_s17, 1024, %s3571_s24, %s3575_s25, %s3898_s28, %s3898_s28, %s3897_s22  }
  0xf2   : > { %p3904_p9 = scmp.ne.s32.totalorder %s3886_s16, 0 }
  0xf3   : > { %s3905_s7 = sld [smem:[#allocation27_spill]] (!%p3904_p9)  ;;  %s3906_s18 = sld [smem:[#allocation31_spill]] (!%p3904_p9) }
  0xf4   : > { %552 = sbr.rel (%p3904_p9) target bundleno = 1946 (0x79a), region = 72 }
  0xf9   : > { %s554_s14 = sand.u32 (!%p3904_p9), 1, %s3905_s7   ;;  %p3907_p2 = scmp.ne.s32.totalorder (!%p3904_p9), %s3906_s18, 0 }
  0xfa   : > { %s2197_s19 = sshll.u32 (!%p3904_p9), %s554_s14, 7  ;;  %s555_s13 = scalar_lea.sflag (!%p3904_p9), [#allocation6], %s554_s14 }
  0xfb   : > { %s3605_s27 = scalar_lea.vmem [#allocation5], %s2197_s19 }
  0xfc   : > { %3137 = dma.done.wait (%p3907_p2), %s555_s13, 2048  }
  0xfd   : > { %3139 = vsyncadd (%p3907_p2), %s555_s13, 4294965248  ;;  %s3908_s21 = sld [smem:[#allocation30_spill]]  ;;  %s2198_s12 = sshll.u32 %s554_s14, 6 }
  0xfe   : > { %s3612_s28 = scalar_lea.vmem [#allocation8], %s2198_s12 }
 0x103   : > { %s563_s1 = sand.u32 1, %s3908_s21  }
 0x104   : > { %s564_s22 = scalar_lea.sflag [#allocation9], %s563_s1 }
 0x105   : > { %3141 = dma.done.wait (%p3907_p2), %s564_s22, 2048  }
 0x106   : > { %3143 = vsyncadd (%p3907_p2), %s564_s22, 4294965248  ;;  %s3618_s16 = scalar_lea.vmem [#allocation10], %s2198_s12  ;;  %s582_s17 = scalar_lea.sflag [#allocation12], %s563_s1 }
 0x107   : > { %s3620_s24 = scalar_lea.vmem [#allocation11], %s2198_s12 }
 0x108   : > { %3145 = dma.done.wait (%p3907_p2), %s582_s17, 1024  }
 0x109   : > { %3147 = vsyncadd (%p3907_p2), %s582_s17, 4294966272  ;;  %p3909_p3 = scmp.eq.s32.totalorder %s3908_s21, 0 }
 0x10b   : > { %3149 = dma.done.wait (%p3909_p3), [#allocation12], 1024   ;;  %p3910_p0 = pmov %p3909_p3 }
 0x10d   : > { %3151 = vsyncadd (%p3910_p0), [#allocation12], 4294966272  ;;  %p3911_p7 = pmov %p3910_p0 }
 0x10e   : > { %p3912_p12 = pmov %p3910_p0 }
 0x10f   : > { %3153 = dma.done.wait (%p3911_p7), [#allocation15], 3072  }
 0x110   : > { %3155 = vsyncadd (%p3912_p12), [#allocation15], 4294964224  ;;  %p3913_p4 = pmov %p3910_p0 }
 0x111   : > { %p3914_p5 = pmov %p3910_p0 }
 0x112   : > { %3157 = dma.done.wait (%p3913_p4), [#allocation18], 1024  }
 0x113   : > { %3159 = vsyncadd (%p3914_p5), [#allocation18], 4294966272  ;;  %v3639_v0 = vld [vmem:[%s3605_s27] sm:$0xff]  ;;  %v3642_v1 = vld [vmem:[%s3605_s27 + $0x8] sm:$0xff]  ;;  %s3915_s8 = sld [smem:[#allocation37_spill]]  ;;  %vm3201_vm0 = vmmov 0  }
 0x114   : > { %v3645_v2 = vld [vmem:[%s3605_s27 + $0x10] sm:$0xff]  ;;  %v701_v3 = vpack.c.bf16 %v3642_v1, %v3639_v0  ;;  %v3650_v4 = vld [vmem:[%s3605_s27 + $0x18] sm:$0xff]  ;;  %v3655_v6 = vld [vmem:[%s3605_s27 + $0x20] sm:$0xff]  ;;  %s3916_s26 = sld [smem:[#allocation39_spill]]  ;;  %s3918_s18 = sld [smem:[#allocation35_spill]] }
 0x115   : > { %v702_v5 = vpack.c.bf16 %v3650_v4, %v3645_v2  ;;  %v3658_v7 = vld [vmem:[%s3605_s27 + $0x28] sm:$0xff]  ;;  %v3661_v8 = vld [vmem:[%s3605_s27 + $0x30] sm:$0xff]  ;;  %v3666_v10 = vld [vmem:[%s3605_s27 + $0x38] sm:$0xff]  ;;  %s3917_s5 = sld [smem:[#allocation29_spill]] }
 0x116   : > { %2424 = vmatprep.subr.bf16.mxu0 %v701_v3  ;;  %v703_v9 = vpack.c.bf16 %v3658_v7, %v3655_v6  ;;  %v2798_v11 = vld [vmem:[%s3618_s16] sm:$0xff]   ;;  %v704_v12 = vpack.c.bf16 %v3666_v10, %v3661_v8  ;;  %v3675_v14 = vld [vmem:[%s3605_s27 + $0x48] sm:$0xff]  ;;  %v3680_v16 = vld [vmem:[%s3605_s27 + $0x50] sm:$0xff] }
 0x117   : > { %2425 = vmatpush3.bf16.msra.mxu0 %v701_v3  ;;  %2440 = vmatprep.mubr.bf16.mxu0 %v2798_v11  ;;  %v3672_v13 = vld [vmem:[%s3605_s27 + $0x40] sm:$0xff]  ;;  %v3683_v17 = vld [vmem:[%s3605_s27 + $0x58] sm:$0xff]  ;;  %v3689_v19 = vld [vmem:[%s3605_s27 + $0x68] sm:$0xff] }
 0x118   : > { %2426 = vmatprep.subr.bf16.mxu0 %v702_v5  ;;  %v705_v15 = vpack.c.bf16 %v3675_v14, %v3672_v13  ;;  %v3686_v18 = vld [vmem:[%s3605_s27 + $0x60] sm:$0xff]  ;;  %v706_v20 = vpack.c.bf16 %v3683_v17, %v3680_v16  ;;  %v3694_v21 = vld [vmem:[%s3605_s27 + $0x70] sm:$0xff]  ;;  %v3697_v22 = vld [vmem:[%s3605_s27 + $0x78] sm:$0xff] }
 0x119   : > { %v707_v23 = vpack.c.bf16 %v3689_v19, %v3686_v18  ;;  %v708_v24 = vpack.c.bf16 %v3697_v22, %v3694_v21  ;;  %v2799_v25 = vld [vmem:[%s3618_s16 + $0x8] sm:$0xff]   ;;  %v2800_v26 = vld [vmem:[%s3618_s16 + $0x10] sm:$0xff]   ;;  %v2801_v27 = vld [vmem:[%s3618_s16 + $0x18] sm:$0xff]  }
 0x11a   : > { %v2802_v28 = vld [vmem:[%s3618_s16 + $0x20] sm:$0xff]   ;;  %v2803_v29 = vld [vmem:[%s3618_s16 + $0x28] sm:$0xff]   ;;  %v2804_v30 = vld [vmem:[%s3618_s16 + $0x30] sm:$0xff]  }
 0x11b   : > { %2427 = vmatpush3.bf16.msra.mxu0 %v702_v5  ;;  %v2805_v31 = vld [vmem:[%s3618_s16 + $0x38] sm:$0xff]   ;;  %v2806_v32 = vld [vmem:[%s3620_s24] sm:$0xff]   ;;  %v2815_v34 = vld [vmem:[#allocation13 + $0x8] sm:$0xff]   ;;  %p660_p10 = scmp.lt.s32.totalorder %s3917_s5, 1  ;;  %p1644_p11 = scmp.eq.s32.totalorder %s3917_s5, 1 }
 0x11c   : > { %2428 = vmatprep.subr.bf16.mxu0 %v703_v9  ;;  %2472 = vmatprep.mubr.bf16.mxu1 %v2806_v32  ;;  %v2814_v33 = vld [vmem:[#allocation13] sm:$0xff]   ;;  %v2816_v35 = vld [vmem:[#allocation13 + $0x10] sm:$0xff]   ;;  %v2817_v36 = vld [vmem:[#allocation13 + $0x18] sm:$0xff]   ;;  %s2240_s19 = sshll.u32 %s3917_s5, 1  ;;  %vm3204_vm1 = vmmov (%p1644_p11), 0   ;;  %s3919_s1 = sld [smem:[#allocation40_spill]] (%p1644_p11) }
 0x11d   : > { %v2818_v37 = vld [vmem:[#allocation13 + $0x20] sm:$0xff]   ;;  %v2819_v38 = vld [vmem:[#allocation13 + $0x28] sm:$0xff]   ;;  %v2311_v50 = vld [vmem:[%s3612_s28 + $0x18] sm:$0xff]   ;;  %s661_s20 = scalar_select %p660_p10, %s3917_s5, 1 }
 0x11e   : > { %v2309_v39 = vld [vmem:[%s3612_s28 + $0x8] sm:$0xff]   ;;  %v2278_v40 = vld [vmem:[%s3612_s28] sm:$0xff]   ;;  %v2310_v53 = vld [vmem:[%s3612_s28 + $0x10] sm:$0xff]   ;;  %v2291_v57 = vunpack.c.l.bf16 %v2311_v50  ;;  %v2292_v62 = vunpack.c.h.bf16 %v2311_v50  ;;  %s1642_s13 = scalar_lea.vmem [#allocation3], %s2240_s19 }
 0x11f   : > { %2429 = vmatpush3.bf16.msra.mxu0 %v703_v9  ;;  %v2283_v41 = vunpack.c.l.bf16 %v2309_v39  ;;  %v2279_v42 = vunpack.c.l.bf16 %v2278_v40  ;;  %v2284_v43 = vunpack.c.h.bf16 %v2309_v39  ;;  %v2280_v45 = vunpack.c.h.bf16 %v2278_v40  ;;  %s2205_s23 = sshll.u32 %s661_s20, 1 }
 0x120   : > { %2430 = vmatprep.subr.bf16.mxu0 %v704_v12  ;;  %v2287_v60 = vunpack.c.l.bf16 %v2310_v53  ;;  %v2288_v5 = vunpack.c.h.bf16 %v2310_v53  ;;  %s663_s14 = scalar_lea.vmem %s3918_s18, %s2205_s23 }
 0x123   : > { %2431 = vmatpush3.bf16.msra.mxu0 %v704_v12 }
 0x124   : > { %2432 = vmatprep.subr.bf16.mxu0 %v705_v15 }
 0x127   : > { %2433 = vmatpush3.bf16.msra.mxu0 %v705_v15 }
 0x128   : > { %2434 = vmatprep.subr.bf16.mxu0 %v706_v20 }
 0x12b   : > { %2435 = vmatpush3.bf16.msra.mxu0 %v706_v20  ;;  %v2313_v20 = vld [vmem:[%s3612_s28 + $0x28] sm:$0xff]  }
 0x12c   : > { %2436 = vmatprep.subr.bf16.mxu0 %v707_v23 }
 0x12f   : > { %2437 = vmatpush3.bf16.msra.mxu0 %v707_v23 }
 0x130   : > { %2438 = vmatprep.subr.bf16.mxu0 %v708_v24 }
 0x133   : > { %2439 = vmatpush3.bf16.msra.mxu0 %v708_v24 }
 0x134   : > { %2488 = vmatprep.subr.bf16.mxu0 %v2814_v33 }
 0x136   : > { %2441 = vmatmul.mubr.bf16.vlgmr.msra.gmra.mrb[0].mxu0 %v2799_v25  ;;  %v2312_v25 = vld [vmem:[%s3612_s28 + $0x20] sm:$0xff]  }
 0x137   : > { %2444 = vmatprep.mubr.bf16.mxu0 %v2800_v26  ;;  %2489 = vmatpush3.bf16.msra.mxu0 %v2814_v33  ;;  %v2295_v32 = vunpack.c.l.bf16 %v2312_v25 }
 0x138   : > { %2490 = vmatprep.subr.bf16.mxu0 %v2815_v34 }
 0x13b   : > { %2491 = vmatpush3.bf16.msra.mxu0 %v2815_v34  ;;  %v2300_v34 = vunpack.c.h.bf16 %v2313_v20 }
 0x13c   : > { %2492 = vmatprep.subr.bf16.mxu0 %v2816_v35 }
 0x13e   : > { %2445 = vmatmul.mubr.bf16.gmra.mrb[4].mxu0 %v2801_v27 }
 0x13f   : > { %2448 = vmatprep.mubr.bf16.mxu0 %v2802_v28  ;;  %2493 = vmatpush3.bf16.msra.mxu0 %v2816_v35 }
 0x140   : > { %2494 = vmatprep.subr.bf16.mxu0 %v2817_v36 }
 0x143   : > { %2495 = vmatpush3.bf16.msra.mxu0 %v2817_v36 }
 0x144   : > { %2496 = vmatprep.subr.bf16.mxu0 %v2818_v37 }
 0x146   : > { %2449 = vmatmul.mubr.bf16.gmra.mrb[8].mxu0 %v2803_v29  ;;  %v2299_v29 = vunpack.c.l.bf16 %v2313_v20 }
 0x147   : > { %2452 = vmatprep.mubr.bf16.mxu0 %v2804_v30  ;;  %2497 = vmatpush3.bf16.msra.mxu0 %v2818_v37  ;;  %v2296_v37 = vunpack.c.h.bf16 %v2312_v25  ;;  %v2809_v25 = vld [vmem:[%s3620_s24 + $0x18] sm:$0xff]  }
 0x148   : > { %2498 = vmatprep.subr.bf16.mxu0 %v2819_v38 }
 0x14b   : > { %2499 = vmatpush3.bf16.msra.mxu0 %v2819_v38 }
 0x14e   : > { %2453 = vmatmul.mubr.bf16.gmra.mrb[12].mxu0 %v2805_v31 }
 0x209   : > { %v2442_v44 = vpop.f32.mrb[0].mxu0 }
 0x20a   : > { %v864_v46 = vadd.f32 %v2442_v44, %v2283_v41  ;;  %v855_v47 = vpop.f32.mrb[1].mxu0 }
 0x20b   : > { %v856_v48 = vadd.f32 %v2279_v42, %v855_v47  ;;  %v2443_v49 = vpop.f32.mrb[2].mxu0  ;;  %v2315_v42 = vld [vmem:[%s3612_s28 + $0x38] sm:$0xff]  }
 0x20c   : > { %v867_v51 = vadd.f32 %v2443_v49, %v2284_v43  ;;  %v858_v52 = vpop.f32.mrb[3].mxu0  ;;  %v920_v55 = vmax.f32 %v864_v46, 0.0  ;;  %v2307_v49 = vunpack.c.l.bf16 %v2315_v42 }
 0x20d   : > { %v859_v54 = vadd.f32 %v2280_v45, %v858_v52  ;;  %v918_v58 = vmax.f32 %v856_v48, 0.0  ;;  %v2314_v45 = vld [vmem:[%s3612_s28 + $0x30] sm:$0xff]   ;;  %s3920_s28 = sld [smem:[#allocation41_spill]] (%p1644_p11) }
 0x20e   : > { %v921_v56 = vmax.f32 %v867_v51, 0.0  ;;  %v2303_v52 = vunpack.c.l.bf16 %v2314_v45 }
 0x20f   : > { %v919_v59 = vmax.f32 %v859_v54, 0.0  ;;  %v2308_v54 = vunpack.c.h.bf16 %v2315_v42 }
 0x210   : > { %v967_v61 = vpack.c.bf16 %v921_v56, %v920_v55 }
 0x211   : > { %v2446_v63 = vpop.f32.mrb[4].mxu0  ;;  %v966_v3 = vpack.c.bf16 %v919_v59, %v918_v58 }
 0x212   : > { %v880_v9 = vadd.f32 %v2446_v63, %v2291_v57  ;;  %v871_v11 = vpop.f32.mrb[5].mxu0  ;;  %v2304_v57 = vunpack.c.h.bf16 %v2314_v45 }
 0x213   : > { %v872_v12 = vadd.f32 %v2287_v60, %v871_v11  ;;  %v2447_v15 = vpop.f32.mrb[6].mxu0  ;;  %2456 = vmatprep.subr.bf16.mxu1 %v966_v3 }
 0x214   : > { %v883_v23 = vadd.f32 %v2447_v15, %v2292_v62  ;;  %v874_v24 = vpop.f32.mrb[7].mxu0  ;;  %2457 = vmatpush3.bf16.msra.mxu1 %v966_v3  ;;  %v924_v27 = vmax.f32 %v880_v9, 0.0 }
 0x215   : > { %v875_v26 = vadd.f32 %v2288_v5, %v874_v24  ;;  %2458 = vmatprep.subr.bf16.mxu1 %v967_v61  ;;  %v922_v30 = vmax.f32 %v872_v12, 0.0  ;;  %v2808_v24 = vld [vmem:[%s3620_s24 + $0x10] sm:$0xff]  }
 0x216   : > { %v925_v28 = vmax.f32 %v883_v23, 0.0  ;;  %v2807_v23 = vld [vmem:[%s3620_s24 + $0x8] sm:$0xff]  }
 0x217   : > { %v923_v31 = vmax.f32 %v875_v26, 0.0  ;;  %v2810_v26 = vld [vmem:[%s3620_s24 + $0x20] sm:$0xff]  }
 0x218   : > { %v969_v33 = vpack.c.bf16 %v925_v28, %v924_v27  ;;  %2459 = vmatpush3.bf16.msra.mxu1 %v967_v61  ;;  %v2811_v27 = vld [vmem:[%s3620_s24 + $0x28] sm:$0xff]   ;;  %v2812_v28 = vld [vmem:[%s3620_s24 + $0x30] sm:$0xff]  }
 0x219   : > { %v968_v35 = vpack.c.bf16 %v923_v31, %v922_v30  ;;  %v2450_v36 = vpop.f32.mrb[8].mxu0  ;;  %v2820_v30 = vld [vmem:[#allocation13 + $0x30] sm:$0xff]   ;;  %v2821_v31 = vld [vmem:[#allocation13 + $0x38] sm:$0xff]  }
 0x21a   : > { %v896_v38 = vadd.f32 %v2450_v36, %v2299_v29  ;;  %v887_v39 = vpop.f32.mrb[9].mxu0  ;;  %v2813_v29 = vld [vmem:[%s3620_s24 + $0x38] sm:$0xff]   ;;  %2500 = vmatprep.subr.bf16.mxu0 %v2820_v30  ;;  %v2826_v36 = vld [vmem:[#allocation14 + $0x20] sm:$0xff]  }
 0x21b   : > { %v888_v40 = vadd.f32 %v2295_v32, %v887_v39  ;;  %v2451_v41 = vpop.f32.mrb[10].mxu0  ;;  %2460 = vmatprep.subr.bf16.mxu1 %v968_v35  ;;  %2501 = vmatpush3.bf16.msra.mxu0 %v2820_v30  ;;  %v2822_v32 = vld [vmem:[#allocation14] sm:$0xff]  }
 0x21c   : > { %v899_v43 = vadd.f32 %v2451_v41, %v2300_v34  ;;  %v890_v44 = vpop.f32.mrb[11].mxu0  ;;  %2461 = vmatpush3.bf16.msra.mxu1 %v968_v35  ;;  %v928_v47 = vmax.f32 %v896_v38, 0.0  ;;  %2502 = vmatprep.subr.bf16.mxu0 %v2821_v31  ;;  %v2824_v34 = vld [vmem:[#allocation14 + $0x10] sm:$0xff]   ;;  %v2825_v35 = vld [vmem:[#allocation14 + $0x18] sm:$0xff]  }
 0x21d   : > { %v891_v46 = vadd.f32 %v2296_v37, %v890_v44  ;;  %2462 = vmatprep.subr.bf16.mxu1 %v969_v33  ;;  %v926_v50 = vmax.f32 %v888_v40, 0.0  ;;  %v2827_v37 = vld [vmem:[#allocation14 + $0x28] sm:$0xff]  }
 0x21e   : > { %v929_v48 = vmax.f32 %v899_v43, 0.0 }
 0x21f   : > { %v927_v51 = vmax.f32 %v891_v46, 0.0  ;;  %2503 = vmatpush3.bf16.msra.mxu0 %v2821_v31 }
 0x220   : > { %v971_v53 = vpack.c.bf16 %v929_v48, %v928_v47  ;;  %2463 = vmatpush3.bf16.msra.mxu1 %v969_v33  ;;  %v2823_v33 = vld [vmem:[#allocation14 + $0x8] sm:$0xff]  }
 0x221   : > { %v970_v55 = vpack.c.bf16 %v927_v51, %v926_v50  ;;  %v2454_v56 = vpop.f32.mrb[12].mxu0 }
 0x222   : > { %v912_v58 = vadd.f32 %v2454_v56, %v2307_v49  ;;  %v903_v59 = vpop.f32.mrb[13].mxu0 }
 0x223   : > { %v904_v60 = vadd.f32 %v2303_v52, %v903_v59  ;;  %v2455_v61 = vpop.f32.mrb[14].mxu0  ;;  %2464 = vmatprep.subr.bf16.mxu1 %v970_v55 }
 0x224   : > { %v915_v62 = vadd.f32 %v2455_v61, %v2308_v54  ;;  %v906_v63 = vpop.f32.mrb[15].mxu0  ;;  %2465 = vmatpush3.bf16.msra.mxu1 %v970_v55  ;;  %v932_v5 = vmax.f32 %v912_v58, 0.0 }
 0x225   : > { %v907_v3 = vadd.f32 %v2304_v57, %v906_v63  ;;  %2466 = vmatprep.subr.bf16.mxu1 %v971_v53  ;;  %v930_v11 = vmax.f32 %v904_v60, 0.0 }
 0x226   : > { %v933_v9 = vmax.f32 %v915_v62, 0.0 }
 0x227   : > { %v931_v12 = vmax.f32 %v907_v3, 0.0 }
 0x228   : > { %v973_v15 = vpack.c.bf16 %v933_v9, %v932_v5  ;;  %2467 = vmatpush3.bf16.msra.mxu1 %v971_v53 }
 0x229   : > { %v972_v20 = vpack.c.bf16 %v931_v12, %v930_v11  ;;  %v2829_v11 = vld [vmem:[#allocation14 + $0x38] sm:$0xff]  }
 0x22b   : > { %2468 = vmatprep.subr.bf16.mxu1 %v972_v20 }
 0x22c   : > { %2469 = vmatpush3.bf16.msra.mxu1 %v972_v20 }
 0x22d   : > { %2470 = vmatprep.subr.bf16.mxu1 %v973_v15 }
 0x230   : > { %2471 = vmatpush3.bf16.msra.mxu1 %v973_v15 }
 0x231   : > { %2520 = vmatprep.subr.bf16.mxu1 %v2822_v32 }
 0x233   : > { %2473 = vmatmul.mubr.bf16.vlgmr.msra.gmra.mrb[0].mxu1 %v2807_v23 }
 0x234   : > { %2476 = vmatprep.mubr.bf16.mxu1 %v2808_v24  ;;  %2521 = vmatpush3.bf16.msra.mxu1 %v2822_v32 }
 0x235   : > { %2522 = vmatprep.subr.bf16.mxu1 %v2823_v33 }
 0x238   : > { %2523 = vmatpush3.bf16.msra.mxu1 %v2823_v33 }
 0x239   : > { %2524 = vmatprep.subr.bf16.mxu1 %v2824_v34 }
 0x23b   : > { %2477 = vmatmul.mubr.bf16.gmra.mrb[4].mxu1 %v2809_v25 }
 0x23c   : > { %2480 = vmatprep.mubr.bf16.mxu1 %v2810_v26  ;;  %2525 = vmatpush3.bf16.msra.mxu1 %v2824_v34 }
 0x23d   : > { %2526 = vmatprep.subr.bf16.mxu1 %v2825_v35 }
 0x240   : > { %2527 = vmatpush3.bf16.msra.mxu1 %v2825_v35 }
 0x241   : > { %2528 = vmatprep.subr.bf16.mxu1 %v2826_v36 }
 0x243   : > { %2481 = vmatmul.mubr.bf16.gmra.mrb[8].mxu1 %v2811_v27 }
 0x244   : > { %2484 = vmatprep.mubr.bf16.mxu1 %v2812_v28  ;;  %2529 = vmatpush3.bf16.msra.mxu1 %v2826_v36 }
 0x245   : > { %2530 = vmatprep.subr.bf16.mxu1 %v2827_v37 }
 0x248   : > { %2531 = vmatpush3.bf16.msra.mxu1 %v2827_v37 }
 0x24b   : > { %2485 = vmatmul.mubr.bf16.gmra.mrb[12].mxu1 %v2813_v29 }
 0x306   : > { %v2474_v38 = vpop.f32.mrb[0].mxu1 }
 0x307   : > { %v1056_v39 = vpop.f32.mrb[1].mxu1  ;;  %v1188_v41 = vadd.f32 %v2474_v38, %v3645_v2 }
 0x308   : > { %v2475_v40 = vpop.f32.mrb[2].mxu1  ;;  %v1186_v44 = vadd.f32 %v1056_v39, %v3639_v0 }
 0x309   : > { %v1189_v42 = vadd.f32 %v2475_v40, %v3650_v4  ;;  %v1059_v43 = vpop.f32.mrb[3].mxu1 }
 0x30a   : > { %v1187_v45 = vadd.f32 %v1059_v43, %v3642_v1 }
 0x30b   : > { %v1203_v46 = vpack.c.bf16 %v1189_v42, %v1188_v41 }
 0x30c   : > { %v1202_v47 = vpack.c.bf16 %v1187_v45, %v1186_v44 }
 0x30e   : > { %v2478_v48 = vpop.f32.mrb[4].mxu1  ;;  %2504 = vmatprep.mubr.bf16.mxu0 %v1202_v47 }
 0x30f   : > { %v1072_v49 = vpop.f32.mrb[5].mxu1  ;;  %2505 = vmatmul.mubr.bf16.vlgmr.msra.gmra.mrb[16].mxu0 %v1203_v46  ;;  %v1192_v51 = vadd.f32 %v2478_v48, %v3661_v8 }
 0x310   : > { %v2479_v50 = vpop.f32.mrb[6].mxu1  ;;  %v1190_v2 = vadd.f32 %v1072_v49, %v3655_v6 }
 0x311   : > { %v1193_v52 = vadd.f32 %v2479_v50, %v3666_v10  ;;  %v1075_v53 = vpop.f32.mrb[7].mxu1 }
 0x312   : > { %v1191_v4 = vadd.f32 %v1075_v53, %v3658_v7 }
 0x313   : > { %v1205_v54 = vpack.c.bf16 %v1193_v52, %v1192_v51 }
 0x314   : > { %v1204_v0 = vpack.c.bf16 %v1191_v4, %v1190_v2 }
 0x316   : > { %v2482_v55 = vpop.f32.mrb[8].mxu1  ;;  %2508 = vmatprep.mubr.bf16.mxu0 %v1204_v0 }
 0x317   : > { %v1088_v1 = vpop.f32.mrb[9].mxu1  ;;  %2509 = vmatmul.mubr.bf16.gmra.mrb[20].mxu0 %v1205_v54  ;;  %v1196_v57 = vadd.f32 %v2482_v55, %v3680_v16 }
 0x318   : > { %v2483_v56 = vpop.f32.mrb[10].mxu1  ;;  %v1194_v8 = vadd.f32 %v1088_v1, %v3672_v13 }
 0x319   : > { %v1197_v58 = vadd.f32 %v2483_v56, %v3683_v17  ;;  %v1091_v59 = vpop.f32.mrb[11].mxu1 }
 0x31a   : > { %v1195_v10 = vadd.f32 %v1091_v59, %v3675_v14  ;;  %v2828_v14 = vld [vmem:[#allocation14 + $0x30] sm:$0xff]  }
 0x31b   : > { %v1207_v60 = vpack.c.bf16 %v1197_v58, %v1196_v57  ;;  %2532 = vmatprep.subr.bf16.mxu1 %v2828_v14 }
 0x31c   : > { %v1206_v6 = vpack.c.bf16 %v1195_v10, %v1194_v8  ;;  %2533 = vmatpush3.bf16.msra.mxu1 %v2828_v14 }
 0x31d   : > { %2534 = vmatprep.subr.bf16.mxu1 %v2829_v11 }
 0x31e   : > { %v2486_v61 = vpop.f32.mrb[12].mxu1  ;;  %2512 = vmatprep.mubr.bf16.mxu0 %v1206_v6 }
 0x31f   : > { %v1104_v7 = vpop.f32.mrb[13].mxu1  ;;  %2513 = vmatmul.mubr.bf16.gmra.mrb[24].mxu0 %v1207_v60  ;;  %v1200_v63 = vadd.f32 %v2486_v61, %v3694_v21  ;;  %v2222_v21 = vld [vmem:[%s3915_s8] ss:$0 sm:$0xff] }
 0x320   : > { %v2487_v62 = vpop.f32.mrb[14].mxu1  ;;  %v1198_v16 = vadd.f32 %v1104_v7, %v3686_v18  ;;  %2535 = vmatpush3.bf16.msra.mxu1 %v2829_v11 }
 0x321   : > { %v1201_v3 = vadd.f32 %v2487_v62, %v3697_v22  ;;  %v1107_v5 = vpop.f32.mrb[15].mxu1 }
 0x322   : > { %v1199_v17 = vadd.f32 %v1107_v5, %v3689_v19  ;;  %v3200_v5 = vmov 0.0|0.0  }
 0x323   : > { %v1209_v9 = vpack.c.bf16 %v1201_v3, %v1200_v63  ;;  %2647 = vmatprep.subr.bf16.mxu0 %v3200_v5 }
 0x324   : > { %v1208_v13 = vpack.c.bf16 %v1199_v17, %v1198_v16  ;;  %v3202_v16 = vmov 0.0  }
 0x326   : > { %2516 = vmatprep.mubr.bf16.mxu0 %v1208_v13 }
 0x327   : > { %2517 = vmatmul.mubr.bf16.gmra.mrb[28].mxu0 %v1209_v9  ;;  %v2231_v9 = vld [vmem:[%s3916_s26] ss:$0 sm:$0xff] }
 0x328   : > { %2584 = vmatprep.mubr.msk.f32.mxu0 %vm3201_vm0, %v3202_v16 }
 0x3e2   : > { %v2506_v22 = vpop.f32.mrb[16].mxu0 }
 0x3e3   : > { %v1324_v12 = vadd.f32 %v2506_v22, %v2222_v21  ;;  %v1315_v15 = vpop.f32.mrb[17].mxu0 }
 0x3e4   : > { %v1316_v18 = vadd.f32 %v2222_v21, %v1315_v15  ;;  %v2507_v20 = vpop.f32.mrb[18].mxu0 }
 0x3e5   : > { %v1327_v19 = vadd.f32 %v2507_v20, %v2222_v21  ;;  %v1318_v23 = vpop.f32.mrb[19].mxu0  ;;  %v1380_v25 = vmax.f32 %v1324_v12, 0.0 }
 0x3e6   : > { %v1319_v24 = vadd.f32 %v2222_v21, %v1318_v23  ;;  %v1378_v27 = vmax.f32 %v1316_v18, 0.0 }
 0x3e7   : > { %v1381_v26 = vmax.f32 %v1327_v19, 0.0 }
 0x3e8   : > { %v1379_v28 = vmax.f32 %v1319_v24, 0.0 }
 0x3e9   : > { %v1395_v29 = vpack.c.bf16 %v1381_v26, %v1380_v25 }
 0x3ea   : > { %v1394_v30 = vpack.c.bf16 %v1379_v28, %v1378_v27  ;;  %v2510_v31 = vpop.f32.mrb[20].mxu0 }
 0x3eb   : > { %v1340_v32 = vadd.f32 %v2510_v31, %v2222_v21  ;;  %v1331_v33 = vpop.f32.mrb[21].mxu0 }
 0x3ec   : > { %v1332_v34 = vadd.f32 %v2222_v21, %v1331_v33  ;;  %v2511_v35 = vpop.f32.mrb[22].mxu0  ;;  %2536 = vmatprep.mubr.bf16.mxu1 %v1394_v30 }
 0x3ed   : > { %v1343_v36 = vadd.f32 %v2511_v35, %v2222_v21  ;;  %v1334_v37 = vpop.f32.mrb[23].mxu0  ;;  %2537 = vmatmul.mubr.bf16.vlgmr.msra.gmra.mrb[16].mxu1 %v1395_v29  ;;  %v1384_v39 = vmax.f32 %v1340_v32, 0.0 }
 0x3ee   : > { %v1335_v38 = vadd.f32 %v2222_v21, %v1334_v37  ;;  %v1382_v41 = vmax.f32 %v1332_v34, 0.0 }
 0x3ef   : > { %v1385_v40 = vmax.f32 %v1343_v36, 0.0 }
 0x3f0   : > { %v1383_v42 = vmax.f32 %v1335_v38, 0.0 }
 0x3f1   : > { %v1397_v43 = vpack.c.bf16 %v1385_v40, %v1384_v39 }
 0x3f2   : > { %v1396_v44 = vpack.c.bf16 %v1383_v42, %v1382_v41  ;;  %v2514_v45 = vpop.f32.mrb[24].mxu0 }
 0x3f3   : > { %v1356_v46 = vadd.f32 %v2514_v45, %v2222_v21  ;;  %v1347_v47 = vpop.f32.mrb[25].mxu0 }
 0x3f4   : > { %v1348_v48 = vadd.f32 %v2222_v21, %v1347_v47  ;;  %v2515_v49 = vpop.f32.mrb[26].mxu0  ;;  %2540 = vmatprep.mubr.bf16.mxu1 %v1396_v44 }
 0x3f5   : > { %v1359_v50 = vadd.f32 %v2515_v49, %v2222_v21  ;;  %v1350_v51 = vpop.f32.mrb[27].mxu0  ;;  %2541 = vmatmul.mubr.bf16.gmra.mrb[20].mxu1 %v1397_v43  ;;  %v1388_v53 = vmax.f32 %v1356_v46, 0.0 }
 0x3f6   : > { %v1351_v52 = vadd.f32 %v2222_v21, %v1350_v51  ;;  %v1386_v4 = vmax.f32 %v1348_v48, 0.0 }
 0x3f7   : > { %v1389_v2 = vmax.f32 %v1359_v50, 0.0 }
 0x3f8   : > { %v1387_v54 = vmax.f32 %v1351_v52, 0.0  ;;  %v1570_v52 = vld [vmem:[%s663_s14] sm:$0x3] }
 0x3f9   : > { %v1399_v0 = vpack.c.bf16 %v1389_v2, %v1388_v53 }
 0x3fa   : > { %v1398_v55 = vpack.c.bf16 %v1387_v54, %v1386_v4  ;;  %v2518_v1 = vpop.f32.mrb[28].mxu0  ;;  %v2830_v4 = vld [vmem:[#allocation16 + $0x40] sm:$0xff] (%p1644_p11)   ;;  %v3203_v54 = vmov (%p1644_p11), 0.0  }
 0x3fb   : > { %v1372_v56 = vadd.f32 %v2518_v1, %v2222_v21  ;;  %v1363_v57 = vpop.f32.mrb[29].mxu0  ;;  %2607 = vmatprep.subr.bf16.mxu1 (%p1644_p11), %v3203_v54  ;;  %v2833_v1 = vld [vmem:[#allocation16 + $0x8] sm:$0xff] (%p1644_p11)  }
 0x3fc   : > { %v1364_v58 = vadd.f32 %v2222_v21, %v1363_v57  ;;  %v2519_v59 = vpop.f32.mrb[30].mxu0  ;;  %2544 = vmatprep.mubr.bf16.mxu1 %v1398_v55  ;;  %v2832_v55 = vld [vmem:[#allocation16 + $0x48] sm:$0xff] (%p1644_p11)   ;;  %v2835_v57 = vld [vmem:[#allocation16 + $0x10] sm:$0xff] (%p1644_p11)  }
 0x3fd   : > { %v1375_v8 = vadd.f32 %v2519_v59, %v2222_v21  ;;  %v1366_v10 = vpop.f32.mrb[31].mxu0  ;;  %2545 = vmatmul.mubr.bf16.gmra.mrb[24].mxu1 %v1399_v0  ;;  %v1392_v6 = vmax.f32 %v1372_v56, 0.0  ;;  %v2831_v0 = vld [vmem:[#allocation16] sm:$0xff] (%p1644_p11)   ;;  %v2834_v56 = vld [vmem:[#allocation16 + $0x50] sm:$0xff] (%p1644_p11)   ;;  %v2837_v59 = vld [vmem:[#allocation16 + $0x18] sm:$0xff] (%p1644_p11)  }
 0x3fe   : > { %v1367_v60 = vadd.f32 %v2222_v21, %v1366_v10  ;;  %v1390_v7 = vmax.f32 %v1364_v58, 0.0  ;;  %2608 = vmatpush3.bf16.msra.mxu1 (%p1644_p11), %v2831_v0  ;;  %v2836_v58 = vld [vmem:[#allocation16 + $0x58] sm:$0xff] (%p1644_p11)   ;;  %v2839_v10 = vld [vmem:[#allocation16 + $0x20] sm:$0xff] (%p1644_p11)  }
 0x3ff   : > { %v1393_v61 = vmax.f32 %v1375_v8, 0.0  ;;  %2609 = vmatprep.subr.bf16.mxu1 (%p1644_p11), %v3203_v54  ;;  %v2838_v8 = vld [vmem:[#allocation16 + $0x60] sm:$0xff] (%p1644_p11)  }
 0x400   : > { %v1391_v62 = vmax.f32 %v1367_v60, 0.0  ;;  %v2840_v60 = vld [vmem:[#allocation16 + $0x68] sm:$0xff] (%p1644_p11)  }
 0x401   : > { %v1401_v63 = vpack.c.bf16 %v1393_v61, %v1392_v6  ;;  %v2841_v6 = vld [vmem:[#allocation16 + $0x28] sm:$0xff] (%p1644_p11)   ;;  %v2842_v61 = vld [vmem:[#allocation16 + $0x70] sm:$0xff] (%p1644_p11)  }
 0x402   : > { %v1400_v3 = vpack.c.bf16 %v1391_v62, %v1390_v7  ;;  %2610 = vmatpush3.bf16.msra.mxu1 (%p1644_p11), %v2833_v1  ;;  %v2843_v7 = vld [vmem:[#allocation16 + $0x30] sm:$0xff] (%p1644_p11)   ;;  %v2844_v62 = vld [vmem:[#allocation16 + $0x78] sm:$0xff] (%p1644_p11)  }
 0x403   : > { %2611 = vmatprep.subr.bf16.mxu1 (%p1644_p11), %v3203_v54 }
 0x404   : > { %2548 = vmatprep.mubr.bf16.mxu1 %v1400_v3  ;;  %v2845_v3 = vld [vmem:[#allocation16 + $0x38] sm:$0xff] (%p1644_p11)  }
 0x405   : > { %2549 = vmatmul.mubr.bf16.gmra.mrb[28].mxu1 %v1401_v63 }
 0x406   : > { %2623 = vmatprep.mubr.msk.bf16.mxu1 (%p1644_p11), %vm3204_vm1, %v3203_v54  ;;  %2612 = vmatpush3.bf16.msra.mxu1 (%p1644_p11), %v2835_v57 }
 0x407   : > { %2613 = vmatprep.subr.bf16.mxu1 (%p1644_p11), %v3203_v54 }
 0x40a   : > { %2614 = vmatpush3.bf16.msra.mxu1 (%p1644_p11), %v2837_v59 }
 0x40b   : > { %2615 = vmatprep.subr.bf16.mxu1 (%p1644_p11), %v3203_v54 }
 0x40e   : > { %2616 = vmatpush3.bf16.msra.mxu1 (%p1644_p11), %v2839_v10 }
 0x40f   : > { %2617 = vmatprep.subr.bf16.mxu1 (%p1644_p11), %v3203_v54 }
 0x412   : > { %2618 = vmatpush3.bf16.msra.mxu1 (%p1644_p11), %v2841_v6 }
 0x413   : > { %2619 = vmatprep.subr.bf16.mxu1 (%p1644_p11), %v3203_v54 }
 0x416   : > { %2620 = vmatpush3.bf16.msra.mxu1 (%p1644_p11), %v2843_v7 }
 0x417   : > { %2621 = vmatprep.subr.bf16.mxu1 (%p1644_p11), %v3203_v54 }
 0x41a   : > { %2622 = vmatpush3.bf16.msra.mxu1 (%p1644_p11), %v2845_v3 }
 0x4c0   : > { %v2538_v17 = vpop.f32.mrb[16].mxu1 }
 0x4c1   : > { %v1507_v13 = vpop.f32.mrb[17].mxu1  ;;  %v1516_v11 = vadd.f32 %v2538_v17, %v2231_v9 }
 0x4c2   : > { %v2539_v14 = vpop.f32.mrb[18].mxu1  ;;  %v1508_v12 = vadd.f32 %v2231_v9, %v1507_v13  ;;  %v2847_v13 = vld [vmem:[#allocation17 + $0x8] sm:$0xff] (%p1644_p11)  }
 0x4c3   : > { %v1519_v21 = vadd.f32 %v2539_v14, %v2231_v9  ;;  %v1510_v22 = vpop.f32.mrb[19].mxu1  ;;  %v2848_v14 = vld [vmem:[#allocation17 + $0x10] sm:$0xff] (%p1644_p11)  }
 0x4c4   : > { %v1511_v15 = vadd.f32 %v2231_v9, %v1510_v22  ;;  %v2851_v22 = vld [vmem:[#allocation17 + $0x28] sm:$0xff] (%p1644_p11)  }
 0x4c5   : > { %v2651_v18 = vpack.c.bf16 %v1519_v21, %v1516_v11  ;;  %v2849_v11 = vld [vmem:[#allocation17 + $0x18] sm:$0xff] (%p1644_p11)   ;;  %v2850_v21 = vld [vmem:[#allocation17 + $0x20] sm:$0xff] (%p1644_p11)  }
 0x4c6   : > { %v2648_v20 = vpack.c.bf16 %v1511_v15, %v1508_v12  ;;  %v2852_v12 = vld [vmem:[#allocation17 + $0x30] sm:$0xff] (%p1644_p11)   ;;  %v2853_v15 = vld [vmem:[#allocation17 + $0x38] sm:$0xff] (%p1644_p11)  }
 0x4c8   : > { %v2542_v19 = vpop.f32.mrb[20].mxu1  ;;  %2649 = vmatpush3.bf16.msra.mxu0 %v2648_v20 }
 0x4c9   : > { %v1523_v23 = vpop.f32.mrb[21].mxu1  ;;  %2650 = vmatprep.subr.bf16.mxu0 %v3200_v5  ;;  %v1532_v25 = vadd.f32 %v2542_v19, %v2231_v9  ;;  %v2258_v19 = vld [vmem:[%s3919_s1] ss:$0 sm:$0xff] (%p1644_p11) }
 0x4ca   : > { %v2543_v24 = vpop.f32.mrb[22].mxu1  ;;  %v1524_v28 = vadd.f32 %v2231_v9, %v1523_v23 }
 0x4cb   : > { %v1535_v26 = vadd.f32 %v2543_v24, %v2231_v9  ;;  %v1526_v27 = vpop.f32.mrb[23].mxu1 }
 0x4cc   : > { %v1527_v29 = vadd.f32 %v2231_v9, %v1526_v27  ;;  %2652 = vmatpush3.bf16.msra.mxu0 %v2651_v18 }
 0x4cd   : > { %v2657_v30 = vpack.c.bf16 %v1535_v26, %v1532_v25  ;;  %2653 = vmatprep.subr.bf16.mxu0 %v3200_v5 }
 0x4ce   : > { %v2654_v31 = vpack.c.bf16 %v1527_v29, %v1524_v28 }
 0x4d0   : > { %v2546_v32 = vpop.f32.mrb[24].mxu1  ;;  %2655 = vmatpush3.bf16.msra.mxu0 %v2654_v31 }
 0x4d1   : > { %v1539_v33 = vpop.f32.mrb[25].mxu1  ;;  %2656 = vmatprep.subr.bf16.mxu0 %v3200_v5  ;;  %v1548_v35 = vadd.f32 %v2546_v32, %v2231_v9 }
 0x4d2   : > { %v2547_v34 = vpop.f32.mrb[26].mxu1  ;;  %v1540_v38 = vadd.f32 %v2231_v9, %v1539_v33  ;;  %v2259_v33 = vld [vmem:[%s3920_s28] ss:$0 sm:$0xff] (%p1644_p11) }
 0x4d3   : > { %v1551_v36 = vadd.f32 %v2547_v34, %v2231_v9  ;;  %v1542_v37 = vpop.f32.mrb[27].mxu1 }
 0x4d4   : > { %v1543_v39 = vadd.f32 %v2231_v9, %v1542_v37  ;;  %2658 = vmatpush3.bf16.msra.mxu0 %v2657_v30 }
 0x4d5   : > { %v2663_v40 = vpack.c.bf16 %v1551_v36, %v1548_v35  ;;  %2659 = vmatprep.subr.bf16.mxu0 %v3200_v5 }
 0x4d6   : > { %v2660_v41 = vpack.c.bf16 %v1543_v39, %v1540_v38 }
 0x4d8   : > { %v2550_v42 = vpop.f32.mrb[28].mxu1  ;;  %2661 = vmatpush3.bf16.msra.mxu0 %v2660_v41 }
 0x4d9   : > { %v1555_v43 = vpop.f32.mrb[29].mxu1  ;;  %2662 = vmatprep.subr.bf16.mxu0 %v3200_v5  ;;  %v1564_v45 = vadd.f32 %v2550_v42, %v2231_v9 }
 0x4da   : > { %v2551_v44 = vpop.f32.mrb[30].mxu1  ;;  %v1556_v48 = vadd.f32 %v2231_v9, %v1555_v43 }
 0x4db   : > { %v1567_v46 = vadd.f32 %v2551_v44, %v2231_v9  ;;  %v1558_v47 = vpop.f32.mrb[31].mxu1 }
 0x4dc   : > { %v1559_v49 = vadd.f32 %v2231_v9, %v1558_v47  ;;  %2664 = vmatpush3.bf16.msra.mxu0 %v2663_v40  ;;  %v2846_v9 = vld [vmem:[#allocation17] sm:$0xff] (%p1644_p11)  }
 0x4dd   : > { %v2669_v50 = vpack.c.bf16 %v1567_v46, %v1564_v45  ;;  %2665 = vmatprep.subr.bf16.mxu0 %v3200_v5 }
 0x4de   : > { %v2666_v51 = vpack.c.bf16 %v1559_v49, %v1556_v48 }
 0x4e0   : > { %2667 = vmatpush3.bf16.msra.mxu0 %v2666_v51 }
 0x4e1   : > { %2668 = vmatprep.subr.bf16.mxu0 %v3200_v5 }
 0x4e4   : > { %2670 = vmatpush3.bf16.msra.mxu0 %v2669_v50 }
 0x4e5   : > { %2587 = vmatprep.subr.bf16.mxu0 (%p1644_p11), %v3203_v54 }
 0x4e7   : > { %2585 = vmatmul.mubr.f32.vlgmr.msra.gmra.mrb[32].mxu0 %v1570_v52 }
 0x4e8   : > { %2588 = vmatpush3.bf16.msra.mxu0 (%p1644_p11), %v2830_v4  ;;  %2603 = vmatprep.mubr.msk.bf16.mxu0 (%p1644_p11), %vm3204_vm1, %v3203_v54 }
 0x4e9   : > { %2589 = vmatprep.subr.bf16.mxu0 (%p1644_p11), %v3203_v54 }
 0x4ec   : > { %2590 = vmatpush3.bf16.msra.mxu0 (%p1644_p11), %v2832_v55 }
 0x4ed   : > { %2591 = vmatprep.subr.bf16.mxu0 (%p1644_p11), %v3203_v54 }
 0x4f0   : > { %2592 = vmatpush3.bf16.msra.mxu0 (%p1644_p11), %v2834_v56 }
 0x4f1   : > { %2593 = vmatprep.subr.bf16.mxu0 (%p1644_p11), %v3203_v54 }
 0x4f4   : > { %2594 = vmatpush3.bf16.msra.mxu0 (%p1644_p11), %v2836_v58 }
 0x4f5   : > { %2595 = vmatprep.subr.bf16.mxu0 (%p1644_p11), %v3203_v54 }
 0x4f8   : > { %2596 = vmatpush3.bf16.msra.mxu0 (%p1644_p11), %v2838_v8 }
 0x4f9   : > { %2597 = vmatprep.subr.bf16.mxu0 (%p1644_p11), %v3203_v54 }
 0x4fc   : > { %2598 = vmatpush3.bf16.msra.mxu0 (%p1644_p11), %v2840_v60 }
 0x4fd   : > { %2599 = vmatprep.subr.bf16.mxu0 (%p1644_p11), %v3203_v54 }
 0x500   : > { %2600 = vmatpush3.bf16.msra.mxu0 (%p1644_p11), %v2842_v61 }
 0x501   : > { %2601 = vmatprep.subr.bf16.mxu0 (%p1644_p11), %v3203_v54 }
 0x504   : > { %2602 = vmatpush3.bf16.msra.mxu0 (%p1644_p11), %v2844_v62 }
 0x505   : > { %2627 = vmatprep.subr.bf16.mxu0 (%p1644_p11), %v3203_v54 }
 0x5b5   : > { %1648 = sbr.rel (!%p1644_p11) target bundleno = 1912 (0x778), region = 116 }
 0x5ba   : > { %v1637_v53 = vpop.f32.mrb[32].mxu0 }
 0x5bb   : > { %1643 = vst [vmem:[%s1642_s13] sm:$0x3] %v1637_v53  ;;  %v2586_v2 = vpop.f32.mrb[33].mxu0 }
 0x5c2   : > { %v1668_v63 = vld [vmem:[#allocation3 + $0x2] sm:$0x3]  ;;  %v1649_v5 = vld [vmem:[#allocation3] sm:$0x3] }
 0x5c3   : > { %v1669_v16 = vpack.c.bf16 %v1668_v63, %v1668_v63  ;;  %v1650_v17 = vpack.c.bf16 %v1649_v5, %v1649_v5 }
 0x5c5   : > { %2604 = vmatmul.mubr.bf16.vlgmr.msra.gmra.mrb[0].mxu0 %v1669_v16  ;;  %2624 = vmatmul.mubr.bf16.vlgmr.msra.gmra.mrb[0].mxu1 %v1650_v17 }
 0x5c6   : > { %2628 = vmatpush3.bf16.msra.mxu0 %v2846_v9  ;;  %2643 = vmatprep.mubr.msk.bf16.mxu0 %vm3204_vm1, %v3203_v54 }
 0x5c7   : > { %2629 = vmatprep.subr.bf16.mxu0 %v3203_v54 }
 0x5ca   : > { %2630 = vmatpush3.bf16.msra.mxu0 %v2847_v13 }
 0x5cb   : > { %2631 = vmatprep.subr.bf16.mxu0 %v3203_v54 }
 0x5ce   : > { %2632 = vmatpush3.bf16.msra.mxu0 %v2848_v14 }
 0x5cf   : > { %2633 = vmatprep.subr.bf16.mxu0 %v3203_v54 }
 0x5d2   : > { %2634 = vmatpush3.bf16.msra.mxu0 %v2849_v11 }
 0x5d3   : > { %2635 = vmatprep.subr.bf16.mxu0 %v3203_v54 }
 0x5d6   : > { %2636 = vmatpush3.bf16.msra.mxu0 %v2850_v21 }
 0x5d7   : > { %2637 = vmatprep.subr.bf16.mxu0 %v3203_v54 }
 0x5da   : > { %2638 = vmatpush3.bf16.msra.mxu0 %v2851_v22 }
 0x5db   : > { %2639 = vmatprep.subr.bf16.mxu0 %v3203_v54 }
 0x5de   : > { %2640 = vmatpush3.bf16.msra.mxu0 %v2852_v12 }
 0x5df   : > { %2641 = vmatprep.subr.bf16.mxu0 %v3203_v54 }
 0x5e2   : > { %2642 = vmatpush3.bf16.msra.mxu0 %v2853_v15 }
 0x698   : > { %v1769_v18 = vpop.f32.mrb[0].mxu0  ;;  %v1857_v20 = vpop.f32.mrb[0].mxu1 }
 0x699   : > { %v2605_v23 = vpop.f32.mrb[1].mxu0  ;;  %v1858_v24 = vadd.f32 %v1857_v20, %v1769_v18  ;;  %v2625_v25 = vpop.f32.mrb[1].mxu1 }
 0x69a   : > { %v1772_v26 = vpop.f32.mrb[2].mxu0  ;;  %v1860_v27 = vpop.f32.mrb[2].mxu1 }
 0x69b   : > { %v2606_v28 = vpop.f32.mrb[3].mxu0  ;;  %v1870_v29 = vadd.f32 %v2258_v19, %v1858_v24  ;;  %v2626_v30 = vpop.f32.mrb[3].mxu1 }
 0x69d   : > { %v1871_v31 = vmax.f32 %v1870_v29, 0.0 }
 0x69f   : > { %v1872_v32 = vpack.c.bf16 %v1871_v31, %v1871_v31 }
 0x6a1   : > { %2644 = vmatmul.mubr.bf16.vlgmr.msra.gmra.mrb[4].mxu0 %v1872_v32 }
 0x774   : > { %v1978_v34 = vpop.f32.mrb[4].mxu0 }
 0x775   : > { %v1979_v35 = vadd.f32 %v2259_v33, %v1978_v34  ;;  %v2645_v36 = vpop.f32.mrb[5].mxu0 }
 0x776   : > { %v1981_v37 = vpop.f32.mrb[6].mxu0 }
 0x777   : > { %1984 = vst [vmem:[#allocation19] sm:$0x3] %v1979_v35  ;;  %v2646_v38 = vpop.f32.mrb[7].mxu0 }
 0x778 PF: > { %s3921_s16 = sld [smem:[#allocation30_spill]]  ;;  %s3205_s17 = smov [#allocation19]  }
 0x779   : > { %s1992_s24 = sshll.u32 %s3205_s17, 4  ;;  %s1993_s24 = int_to_ptr.vmem [resolvable:$true] %s1992_s24 }
 0x77a   : > { %s3086_s25 = scalar_lea.vmem %s1993_s24, 32  ;;  %p3093_p9 = scmp.lt.s32.totalorder %s1993_s24, %s1993_s24 }
 0x77b   : > { %p3087_p13 = scmp.ne.s32.totalorder %s1993_s24, %s3086_s25  ;;  %p3094_p2 = scmp.lt.s32.totalorder %s3086_s25, %s3086_s25 }
 0x77d   : > { %p3095_p3 = por %p3094_p2, %p3093_p9 }
 0x77e   : > { %p2734_p8 = scmp.eq.s32.totalorder %s3921_s16, 1 }
 0x780   : > { %p3088_p6 = pnand %p3087_p13, %p2734_p8 }
 0x782   : > { %p3089_p1 = pneg %p3088_p6 }
 0x784   : > { %p3096_p0 = pnand %p3095_p3, %p3089_p1 }
 0x786   : > { %3099 = shalt.err (!%p3096_p0)
}
 0x787   : > { %s3922_s4 = sld [smem:[#allocation42_spill]] }
 0x78d   : > { %s3100_s6 = scalar_lea.hbm %s3922_s4, 32 }
 0x78e   : > { %p3101_p7 = scmp.ne.s32.totalorder %s3922_s4, %s3100_s6  ;;  %p3106_p5 = scmp.lt.u32.totalorder %s3100_s6, %s3922_s4 }
 0x790   : > { %p3102_p12 = pnand %p3101_p7, %p2734_p8 }
 0x792   : > { %p3103_p4 = pneg %p3102_p12 }
 0x794   : > { %p3108_p10 = pnand %p3106_p5, %p3103_p4 }
 0x796   : > { %3111 = shalt.err (!%p3108_p10)
}
 0x797   : > { %2696 = dma.vmem_to_hbm [thread:$0]  (%p2734_p8), %s1993_s24, 32, %s3922_s4, [#allocation7]  }
 0x798   : > { %3161 = dma.done.wait (%p2734_p8), [#allocation7], 32  }
 0x799   : > { %3163 = vsyncadd (%p2734_p8), [#allocation7], 4294967264 }
 0x79a PF: > { %s35_s30 = sadd.s32 1, %s3186_s30   ;;  %s3923_s25 = sld [smem:[#allocation27_spill]] }
 0x79b   : > { %p32_p11 = scmp.ge.s32.totalorder %s35_s30, 4   ;;  %s3924_s26 = sld [smem:[#allocation28_spill]] }
 0x79c   : > { %s3925_s27 = sld [smem:[#allocation33_spill]]  ;;  %s3926_s18 = sld [smem:[#allocation32_spill]] }
 0x79d   : > { %s3927_s28 = smov %s3182_s29  ;;  %34 = sbr.rel (!%p32_p11) target bundleno = 21 (0x15), region = 180 }
 0x7a2   : > { %s3928_s29 = smov %s3926_s18 }
 0x7a4   :  { %2005 = vsyncpa [#allocation6], 1 }
 0x7a5   :  { %2007 = vsyncpa [#allocation6 + $0x1], 1 }
 0x7a6   :  { %2008 = vsyncpa [#allocation9], 1 }
 0x7a7   :  { %2010 = vsyncpa [#allocation9 + $0x1], 1 }
 0x7a8   :  { %2011 = vsyncpa [#allocation12], 1 }
 0x7a9   :  { %2013 = vsyncpa [#allocation12 + $0x1], 1 }
 0x7aa   :  { %2014 = vsyncpa [#allocation15], 1 }
 0x7ab   :  { %2015 = vsyncpa [#allocation18], 1 }
 0x7ac   :  { %2016 = vsyncpa [#allocation7], 1 }
 0x7ad   :  { %2018 = vsyncpa [#allocation7 + $0x1], 1 }

</bundles_post_ra>
